<compile_context>
chip_gen: v7x
topology: tpu7x:2x2x1
jax: 0.10.0
libtpu: 0.0.40
codegen_flags: <defaults>
</compile_context>

<pallas_src>
import math

import jax
import jax.numpy as jnp
from jax.experimental import pallas as pl
from jax.experimental.pallas import tpu as pltpu

# ---------------- model hyper-parameters (small, deterministic) ----------------
B = 2            # batch
S = 8            # sequence length
H = 32           # bert hidden size (bert.pooler.dense.out_features)
NUM_HEADS = 2
HEAD_DIM = H // NUM_HEADS
INTER = 64       # FFN intermediate size
NUM_LAYERS = 2
VOCAB = 100
MAX_POS = 16
HIDDEN_DIM = 32  # MLP head hidden_dim
NUM_CLASS = 4
LN_EPS = 1e-12


# ---------------- small math helpers (usable inside and outside the kernel) ----------------
def _layer_norm(x, g, b):
    mu = jnp.mean(x, axis=-1, keepdims=True)
    var = jnp.mean((x - mu) ** 2, axis=-1, keepdims=True)
    return (x - mu) * jax.lax.rsqrt(var + LN_EPS) * g + b


def _gelu(x):
    # tanh approximation of GELU.
    # TODO(synk): exact erf-based nn.GELU differs from this approximation at ~1e-3 level.
    c = math.sqrt(2.0 / math.pi)
    return 0.5 * x * (1.0 + jnp.tanh(c * (x + 0.044715 * x * x * x)))


def _softmax_last(x, *, approx=False):
    x = x - jnp.max(x, axis=-1, keepdims=True)
    e = jnp.exp(x)
    s = jnp.sum(e, axis=-1, keepdims=True)
    if approx:
        # EUP reciprocal -- only used inside the Pallas kernel (attention softmax).
        return e * pl.reciprocal(s, approx=True)
    return e / s


# ---------------- in-kernel head split / merge (static slices + concats only) ----------------
def _split_heads(t, b_, s_):
    """(B*S, H) -> (B*NUM_HEADS, S, HEAD_DIM) using static sublane/lane slices only."""
    blocks = []
    for b in range(b_):
        rows = t[b * s_:(b + 1) * s_, :]                                    # (S, H)
        for h in range(NUM_HEADS):
            blocks.append(rows[None, :, h * HEAD_DIM:(h + 1) * HEAD_DIM])   # (1, S, HD)
    return jnp.concatenate(blocks, axis=0)


def _merge_heads(c, b_, s_):
    """(B*NUM_HEADS, S, HEAD_DIM) -> (B*S, H), lane-dense (no masked partial stores)."""
    rows = []
    for b in range(b_):
        heads = [c[b * NUM_HEADS + h] for h in range(NUM_HEADS)]            # (S, HD) each
        rows.append(jnp.concatenate(heads, axis=-1))                        # (S, H)
    return jnp.concatenate(rows, axis=0)                                    # (B*S, H)


# ---------------- the single fused Pallas kernel ----------------
def fused_bert_mlp_kernel(
        emb_ref, mask_ref, emb_g_ref, emb_b_ref,
        wq_ref, bq_ref, wk_ref, bk_ref, wv_ref, bv_ref,
        wo_ref, bo_ref, ln1_g_ref, ln1_b_ref,
        wi_ref, bi_ref, wo2_ref, bo2_ref, ln2_g_ref, ln2_b_ref,
        pool_w_ref, pool_b_ref, fc1_w_ref, fc1_b_ref, fc2_w_ref, fc2_b_ref,
        out_ref):
    n_tok = emb_ref.shape[0]           # B * S
    b_ = n_tok // S
    scale = 1.0 / math.sqrt(HEAD_DIM)
    bf = jnp.bfloat16

    # embedding LayerNorm
    x = _layer_norm(emb_ref[...], emb_g_ref[...], emb_b_ref[...])           # (B*S, H) f32
    mask_bias = mask_ref[...]                                               # (B*NH, S, S) f32

    # encoder layers -- static unroll, activations stay resident (no HBM between layers)
    for l in range(NUM_LAYERS):
        xb = x.astype(bf)
        q = jnp.dot(xb, wq_ref[l], preferred_element_type=jnp.float32) + bq_ref[l]
        k = jnp.dot(xb, wk_ref[l], preferred_element_type=jnp.float32) + bk_ref[l]
        v = jnp.dot(xb, wv_ref[l], preferred_element_type=jnp.float32) + bv_ref[l]

        qh = _split_heads(q, b_, S).astype(bf)                              # (B*NH, S, HD)
        kh = _split_heads(k, b_, S).astype(bf)
        vh = _split_heads(v, b_, S).astype(bf)

        # one batched contraction over (batch*heads); no explicit transpose of K
        scores = jnp.einsum('bqd,bkd->bqk', qh, kh,
                            preferred_element_type=jnp.float32) * scale + mask_bias
        p = _softmax_last(scores, approx=True)
        ctx_h = jnp.einsum('bqk,bkd->bqd', p.astype(bf), vh,
                           preferred_element_type=jnp.float32)
        ctx = _merge_heads(ctx_h, b_, S)                                    # (B*S, H)

        attn = jnp.dot(ctx.astype(bf), wo_ref[l],
                       preferred_element_type=jnp.float32) + bo_ref[l]
        h1 = _layer_norm(x + attn, ln1_g_ref[l], ln1_b_ref[l])

        inter = _gelu(jnp.dot(h1.astype(bf), wi_ref[l],
                              preferred_element_type=jnp.float32) + bi_ref[l])
        ffn = jnp.dot(inter.astype(bf), wo2_ref[l],
                      preferred_element_type=jnp.float32) + bo2_ref[l]
        x = _layer_norm(h1 + ffn, ln2_g_ref[l], ln2_b_ref[l])

    # CLS hidden state (token 0 of each sequence), gathered with static sublane slices
    cls = jnp.concatenate([x[b * S:b * S + 1, :] for b in range(b_)], axis=0)   # (B, H)

    # BERT pooler: tanh(dense(cls))
    pooled = jnp.tanh(jnp.dot(cls.astype(bf), pool_w_ref[...],
                              preferred_element_type=jnp.float32) + pool_b_ref[...])
    # fc1 + ReLU
    hid = jnp.maximum(jnp.dot(pooled.astype(bf), fc1_w_ref[...],
                              preferred_element_type=jnp.float32) + fc1_b_ref[...], 0.0)
    # TODO(synk): nn.Dropout(0.2) modeled in eval mode (identity); train-mode RNG dropout not implemented.
    logits = jnp.dot(hid.astype(bf), fc2_w_ref[...],
                     preferred_element_type=jnp.float32) + fc2_b_ref[...]
    # Softmax(dim=1) == last axis for (B, num_class); exact reciprocal for the final probs
    out_ref[...] = _softmax_last(logits, approx=False)


# ---------------- wrapper: one pallas_call for the whole forward ----------------
def bert_plus_mlp_forward(params, input_ids, attention_mask):
    b_, s_ = input_ids.shape

    # embedding gather is the only plain-JAX compute glue
    word = jnp.take(params["word_emb"], input_ids, axis=0)                 # (B, S, H)
    pos = params["pos_emb"][:s_][None, :, :]
    typ = params["type_emb"][0][None, None, :]                             # token_type_ids = 0
    emb = (word + pos + typ).reshape(b_ * s_, H)                           # (B*S, H)

    # HF-style additive attention mask, hoisted out of the kernel and pre-broadcast
    mask_add = (1.0 - attention_mask.astype(jnp.float32)) * -10000.0       # (B, S)
    mask_bias = jnp.broadcast_to(mask_add[:, None, None, :],
                                 (b_, NUM_HEADS, s_, s_)).reshape(b_ * NUM_HEADS, s_, s_)

    inputs = (emb, mask_bias, params["emb_ln_g"], params["emb_ln_b"],
              params["wq"], params["bq"], params["wk"], params["bk"],
              params["wv"], params["bv"], params["wo"], params["bo"],
              params["ln1_g"], params["ln1_b"],
              params["wi"], params["bi"], params["wo2"], params["bo2"],
              params["ln2_g"], params["ln2_b"],
              params["pool_w"], params["pool_b"],
              params["fc1_w"], params["fc1_b"], params["fc2_w"], params["fc2_b"])

    vmem = pl.BlockSpec(memory_space=pltpu.MemorySpace.VMEM)
    return pl.pallas_call(
        fused_bert_mlp_kernel,
        out_shape=jax.ShapeDtypeStruct((b_, NUM_CLASS), jnp.float32),
        in_specs=[vmem] * len(inputs),
        out_specs=vmem,
    )(*inputs)


# ---------------- parameter construction (deterministic, stacked per-layer weights) ----------------
def init_params(key):
    def nrm(k, shape, scale=0.02):
        return scale * jax.random.normal(k, shape, dtype=jnp.float32)

    keys = iter(jax.random.split(key, 32))
    bf = jnp.bfloat16
    L = NUM_LAYERS
    return {
        "word_emb": nrm(next(keys), (VOCAB, H)),
        "pos_emb": nrm(next(keys), (MAX_POS, H)),
        "type_emb": nrm(next(keys), (2, H)),
        "emb_ln_g": jnp.ones((1, H), jnp.float32),
        "emb_ln_b": jnp.zeros((1, H), jnp.float32),
        # stacked encoder weights (layer axis leading); matmul weights pre-cast to bf16 (MXU-native)
        "wq": nrm(next(keys), (L, H, H)).astype(bf), "bq": jnp.zeros((L, 1, H), jnp.float32),
        "wk": nrm(next(keys), (L, H, H)).astype(bf), "bk": jnp.zeros((L, 1, H), jnp.float32),
        "wv": nrm(next(keys), (L, H, H)).astype(bf), "bv": jnp.zeros((L, 1, H), jnp.float32),
        "wo": nrm(next(keys), (L, H, H)).astype(bf), "bo": jnp.zeros((L, 1, H), jnp.float32),
        "ln1_g": jnp.ones((L, 1, H), jnp.float32), "ln1_b": jnp.zeros((L, 1, H), jnp.float32),
        "wi": nrm(next(keys), (L, H, INTER)).astype(bf), "bi": jnp.zeros((L, 1, INTER), jnp.float32),
        "wo2": nrm(next(keys), (L, INTER, H)).astype(bf), "bo2": jnp.zeros((L, 1, H), jnp.float32),
        "ln2_g": jnp.ones((L, 1, H), jnp.float32), "ln2_b": jnp.zeros((L, 1, H), jnp.float32),
        # pooler + MLP head
        "pool_w": nrm(next(keys), (H, H)).astype(bf), "pool_b": jnp.zeros((1, H), jnp.float32),
        "fc1_w": nrm(next(keys), (H, HIDDEN_DIM)).astype(bf), "fc1_b": jnp.zeros((1, HIDDEN_DIM), jnp.float32),
        "fc2_w": nrm(next(keys), (HIDDEN_DIM, NUM_CLASS)).astype(bf), "fc2_b": jnp.zeros((1, NUM_CLASS), jnp.float32),
    }


# ---------------- plain-JAX reference (mirrors the kernel math; used for a sanity check) ----------------
def reference_forward(params, input_ids, attention_mask):
    b_, s_ = input_ids.shape
    bf = jnp.bfloat16

    def mm(a, w):
        return jnp.dot(a.astype(bf), w, preferred_element_type=jnp.float32)

    word = jnp.take(params["word_emb"], input_ids, axis=0)
    emb = (word + params["pos_emb"][:s_][None] + params["type_emb"][0][None, None]).reshape(b_ * s_, H)
    x = _layer_norm(emb, params["emb_ln_g"], params["emb_ln_b"])
    mask_add = (1.0 - attention_mask.astype(jnp.float32)) * -10000.0

    for l in range(NUM_LAYERS):
        q = mm(x, params["wq"][l]) + params["bq"][l]
        k = mm(x, params["wk"][l]) + params["bk"][l]
        v = mm(x, params["wv"][l]) + params["bv"][l]
        sh = lambda t: t.reshape(b_, s_, NUM_HEADS, HEAD_DIM).transpose(0, 2, 1, 3)
        qh, kh, vh = sh(q), sh(k), sh(v)
        sc = jnp.einsum('bhqd,bhkd->bhqk', qh.astype(bf), kh.astype(bf),
                        preferred_element_type=jnp.float32) / math.sqrt(HEAD_DIM)
        sc = sc + mask_add[:, None, None, :]
        p = jax.nn.softmax(sc, axis=-1)
        ctx = jnp.einsum('bhqk,bhkd->bhqd', p.astype(bf), vh.astype(bf),
                         preferred_element_type=jnp.float32)
        ctx = ctx.transpose(0, 2, 1, 3).reshape(b_ * s_, H)
        h1 = _layer_norm(x + mm(ctx, params["wo"][l]) + params["bo"][l],
                         params["ln1_g"][l], params["ln1_b"][l])
        inter = _gelu(mm(h1, params["wi"][l]) + params["bi"][l])
        x = _layer_norm(h1 + mm(inter, params["wo2"][l]) + params["bo2"][l],
                        params["ln2_g"][l], params["ln2_b"][l])

    cls = x.reshape(b_, s_, H)[:, 0, :]
    pooled = jnp.tanh(mm(cls, params["pool_w"]) + params["pool_b"])
    hid = jax.nn.relu(mm(pooled, params["fc1_w"]) + params["fc1_b"])
    logits = mm(hid, params["fc2_w"]) + params["fc2_b"]
    return jax.nn.softmax(logits, axis=-1)


if __name__ == "__main__":
    key = jax.random.PRNGKey(0)
    pkey, ikey = jax.random.split(key, 2)

    params = init_params(pkey)
    input_ids = jax.random.randint(ikey, (B, S), 0, VOCAB, dtype=jnp.int32)
    # mask: first few tokens valid per row (deterministic)
    lengths = jnp.array([S, S - 3], dtype=jnp.int32)
    attention_mask = (jnp.arange(S)[None, :] < lengths[:, None]).astype(jnp.int32)

    fwd = jax.jit(bert_plus_mlp_forward)
    out = jax.block_until_ready(fwd(params, input_ids, attention_mask))

    assert out.shape == (B, NUM_CLASS)
    assert bool(jnp.all(jnp.isfinite(out)))
    # rows of softmax output should sum to ~1 (final softmax uses an exact reciprocal)
    assert bool(jnp.allclose(jnp.sum(out, axis=1), 1.0, atol=1e-5))

    # sanity-check against a plain-JAX reference (loose tol: approx-EUP reciprocal in attention)
    ref = reference_forward(params, input_ids, attention_mask)
    assert bool(jnp.allclose(out, ref, atol=2e-2))

    print("KERNEL_OK")
</pallas_src>

<mosaic_0001>
module attributes {stable_mosaic.version = 11 : i64} {
  func.func @fused_bert_mlp_kernel(%arg0: memref<16x32xf32, #tpu.memory_space<vmem>>, %arg1: memref<4x8x8xf32, #tpu.memory_space<vmem>>, %arg2: memref<1x32xf32, #tpu.memory_space<vmem>>, %arg3: memref<1x32xf32, #tpu.memory_space<vmem>>, %arg4: memref<2x32x32xbf16, #tpu.memory_space<vmem>>, %arg5: memref<2x1x32xf32, #tpu.memory_space<vmem>>, %arg6: memref<2x32x32xbf16, #tpu.memory_space<vmem>>, %arg7: memref<2x1x32xf32, #tpu.memory_space<vmem>>, %arg8: memref<2x32x32xbf16, #tpu.memory_space<vmem>>, %arg9: memref<2x1x32xf32, #tpu.memory_space<vmem>>, %arg10: memref<2x32x32xbf16, #tpu.memory_space<vmem>>, %arg11: memref<2x1x32xf32, #tpu.memory_space<vmem>>, %arg12: memref<2x1x32xf32, #tpu.memory_space<vmem>>, %arg13: memref<2x1x32xf32, #tpu.memory_space<vmem>>, %arg14: memref<2x32x64xbf16, #tpu.memory_space<vmem>>, %arg15: memref<2x1x64xf32, #tpu.memory_space<vmem>>, %arg16: memref<2x64x32xbf16, #tpu.memory_space<vmem>>, %arg17: memref<2x1x32xf32, #tpu.memory_space<vmem>>, %arg18: memref<2x1x32xf32, #tpu.memory_space<vmem>>, %arg19: memref<2x1x32xf32, #tpu.memory_space<vmem>>, %arg20: memref<32x32xbf16, #tpu.memory_space<vmem>>, %arg21: memref<1x32xf32, #tpu.memory_space<vmem>>, %arg22: memref<32x32xbf16, #tpu.memory_space<vmem>>, %arg23: memref<1x32xf32, #tpu.memory_space<vmem>>, %arg24: memref<32x4xbf16, #tpu.memory_space<vmem>>, %arg25: memref<1x4xf32, #tpu.memory_space<vmem>>, %arg26: memref<2x4xf32, #tpu.memory_space<vmem>>) attributes {dimension_semantics = [], scalar_prefetch = 0 : i64, scratch_operands = 0 : i64, tpu.core_type = #tpu.core_type<tc>} {
    %c0 = arith.constant 0 : index
    %c0_0 = arith.constant 0 : index
    %0 = vector.load %arg0[%c0, %c0_0] : memref<16x32xf32, #tpu.memory_space<vmem>>, vector<16x32xf32>
    %c0_1 = arith.constant 0 : index
    %c0_2 = arith.constant 0 : index
    %1 = vector.load %arg2[%c0_1, %c0_2] : memref<1x32xf32, #tpu.memory_space<vmem>>, vector<1x32xf32>
    %c0_3 = arith.constant 0 : index
    %c0_4 = arith.constant 0 : index
    %2 = vector.load %arg3[%c0_3, %c0_4] : memref<1x32xf32, #tpu.memory_space<vmem>>, vector<1x32xf32>
    %cst = arith.constant dense<0.000000e+00> : vector<16xf32>
    %3 = vector.multi_reduction <add>, %0, %cst [1] : vector<16x32xf32> to vector<16xf32>
    %4 = vector.shape_cast %3 : vector<16xf32> to vector<16x1xf32>
    %cst_5 = arith.constant 3.200000e+01 : f32
    %5 = vector.broadcast %cst_5 : f32 to vector<16x1xf32>
    %6 = arith.divf %4, %5 : vector<16x1xf32>
    %7 = vector.broadcast %6 : vector<16x1xf32> to vector<16x32xf32>
    %8 = arith.subf %0, %7 : vector<16x32xf32>
    %9 = arith.mulf %8, %8 : vector<16x32xf32>
    %cst_6 = arith.constant dense<0.000000e+00> : vector<16xf32>
    %10 = vector.multi_reduction <add>, %9, %cst_6 [1] : vector<16x32xf32> to vector<16xf32>
    %11 = vector.shape_cast %10 : vector<16xf32> to vector<16x1xf32>
    %cst_7 = arith.constant 3.200000e+01 : f32
    %12 = vector.broadcast %cst_7 : f32 to vector<16x1xf32>
    %13 = arith.divf %11, %12 : vector<16x1xf32>
    %14 = vector.broadcast %6 : vector<16x1xf32> to vector<16x32xf32>
    %15 = arith.subf %0, %14 : vector<16x32xf32>
    %cst_8 = arith.constant 9.99999996E-13 : f32
    %16 = vector.broadcast %cst_8 : f32 to vector<16x1xf32>
    %17 = arith.addf %13, %16 : vector<16x1xf32>
    %18 = math.rsqrt %17 : vector<16x1xf32>
    %19 = vector.broadcast %18 : vector<16x1xf32> to vector<16x32xf32>
    %20 = arith.mulf %15, %19 : vector<16x32xf32>
    %21 = vector.broadcast %1 : vector<1x32xf32> to vector<16x32xf32>
    %22 = arith.mulf %20, %21 : vector<16x32xf32>
    %23 = vector.broadcast %2 : vector<1x32xf32> to vector<16x32xf32>
    %24 = arith.addf %22, %23 : vector<16x32xf32>
    %c0_9 = arith.constant 0 : index
    %c0_10 = arith.constant 0 : index
    %c0_11 = arith.constant 0 : index
    %25 = vector.load %arg1[%c0_9, %c0_10, %c0_11] : memref<4x8x8xf32, #tpu.memory_space<vmem>>, vector<4x8x8xf32>
    %26 = arith.truncf %24 : vector<16x32xf32> to vector<16x32xbf16>
    %c0_12 = arith.constant 0 : index
    %c0_13 = arith.constant 0 : index
    %c0_14 = arith.constant 0 : index
    %27 = vector.load %arg4[%c0_12, %c0_13, %c0_14] : memref<2x32x32xbf16, #tpu.memory_space<vmem>>, vector<1x32x32xbf16>
    %28 = vector.shape_cast %27 : vector<1x32x32xbf16> to vector<32x32xbf16>
    %cst_15 = arith.constant dense<0.000000e+00> : vector<16x32xf32>
    %29 = tpu.matmul %26, %28, %cst_15 {dimension_numbers = #tpu.dot_dimension_numbers<[1], [0], [0], [1], [0, 0, 1, 1], [], []>} : vector<16x32xbf16>, vector<32x32xbf16>, vector<16x32xf32> -> vector<16x32xf32>
    %c0_16 = arith.constant 0 : index
    %c0_17 = arith.constant 0 : index
    %c0_18 = arith.constant 0 : index
    %30 = vector.load %arg5[%c0_16, %c0_17, %c0_18] : memref<2x1x32xf32, #tpu.memory_space<vmem>>, vector<1x1x32xf32>
    %31 = vector.shape_cast %30 : vector<1x1x32xf32> to vector<1x32xf32>
    %32 = vector.broadcast %31 : vector<1x32xf32> to vector<16x32xf32>
    %33 = arith.addf %29, %32 : vector<16x32xf32>
    %c0_19 = arith.constant 0 : index
    %c0_20 = arith.constant 0 : index
    %c0_21 = arith.constant 0 : index
    %34 = vector.load %arg6[%c0_19, %c0_20, %c0_21] : memref<2x32x32xbf16, #tpu.memory_space<vmem>>, vector<1x32x32xbf16>
    %35 = vector.shape_cast %34 : vector<1x32x32xbf16> to vector<32x32xbf16>
    %cst_22 = arith.constant dense<0.000000e+00> : vector<16x32xf32>
    %36 = tpu.matmul %26, %35, %cst_22 {dimension_numbers = #tpu.dot_dimension_numbers<[1], [0], [0], [1], [0, 0, 1, 1], [], []>} : vector<16x32xbf16>, vector<32x32xbf16>, vector<16x32xf32> -> vector<16x32xf32>
    %c0_23 = arith.constant 0 : index
    %c0_24 = arith.constant 0 : index
    %c0_25 = arith.constant 0 : index
    %37 = vector.load %arg7[%c0_23, %c0_24, %c0_25] : memref<2x1x32xf32, #tpu.memory_space<vmem>>, vector<1x1x32xf32>
    %38 = vector.shape_cast %37 : vector<1x1x32xf32> to vector<1x32xf32>
    %39 = vector.broadcast %38 : vector<1x32xf32> to vector<16x32xf32>
    %40 = arith.addf %36, %39 : vector<16x32xf32>
    %c0_26 = arith.constant 0 : index
    %c0_27 = arith.constant 0 : index
    %c0_28 = arith.constant 0 : index
    %41 = vector.load %arg8[%c0_26, %c0_27, %c0_28] : memref<2x32x32xbf16, #tpu.memory_space<vmem>>, vector<1x32x32xbf16>
    %42 = vector.shape_cast %41 : vector<1x32x32xbf16> to vector<32x32xbf16>
    %cst_29 = arith.constant dense<0.000000e+00> : vector<16x32xf32>
    %43 = tpu.matmul %26, %42, %cst_29 {dimension_numbers = #tpu.dot_dimension_numbers<[1], [0], [0], [1], [0, 0, 1, 1], [], []>} : vector<16x32xbf16>, vector<32x32xbf16>, vector<16x32xf32> -> vector<16x32xf32>
    %c0_30 = arith.constant 0 : index
    %c0_31 = arith.constant 0 : index
    %c0_32 = arith.constant 0 : index
    %44 = vector.load %arg9[%c0_30, %c0_31, %c0_32] : memref<2x1x32xf32, #tpu.memory_space<vmem>>, vector<1x1x32xf32>
    %45 = vector.shape_cast %44 : vector<1x1x32xf32> to vector<1x32xf32>
    %46 = vector.broadcast %45 : vector<1x32xf32> to vector<16x32xf32>
    %47 = arith.addf %43, %46 : vector<16x32xf32>
    %48 = vector.extract_strided_slice %33 {offsets = [0, 0], sizes = [8, 32], strides = [1, 1]} : vector<16x32xf32> to vector<8x32xf32>
    %49 = vector.extract_strided_slice %48 {offsets = [0, 0], sizes = [8, 16], strides = [1, 1]} : vector<8x32xf32> to vector<8x16xf32>
    %50 = vector.shape_cast %49 : vector<8x16xf32> to vector<1x8x16xf32>
    %51 = vector.extract_strided_slice %48 {offsets = [0, 16], sizes = [8, 16], strides = [1, 1]} : vector<8x32xf32> to vector<8x16xf32>
    %52 = vector.shape_cast %51 : vector<8x16xf32> to vector<1x8x16xf32>
    %53 = vector.extract_strided_slice %33 {offsets = [8, 0], sizes = [8, 32], strides = [1, 1]} : vector<16x32xf32> to vector<8x32xf32>
    %54 = vector.extract_strided_slice %53 {offsets = [0, 0], sizes = [8, 16], strides = [1, 1]} : vector<8x32xf32> to vector<8x16xf32>
    %55 = vector.shape_cast %54 : vector<8x16xf32> to vector<1x8x16xf32>
    %56 = vector.extract_strided_slice %53 {offsets = [0, 16], sizes = [8, 16], strides = [1, 1]} : vector<8x32xf32> to vector<8x16xf32>
    %57 = vector.shape_cast %56 : vector<8x16xf32> to vector<1x8x16xf32>
    %58 = tpu.concatenate %50, %52, %55, %57 in 0 : vector<1x8x16xf32>, vector<1x8x16xf32>, vector<1x8x16xf32>, vector<1x8x16xf32> -> vector<4x8x16xf32>
    %59 = arith.truncf %58 : vector<4x8x16xf32> to vector<4x8x16xbf16>
    %60 = vector.extract_strided_slice %40 {offsets = [0, 0], sizes = [8, 32], strides = [1, 1]} : vector<16x32xf32> to vector<8x32xf32>
    %61 = vector.extract_strided_slice %60 {offsets = [0, 0], sizes = [8, 16], strides = [1, 1]} : vector<8x32xf32> to vector<8x16xf32>
    %62 = vector.shape_cast %61 : vector<8x16xf32> to vector<1x8x16xf32>
    %63 = vector.extract_strided_slice %60 {offsets = [0, 16], sizes = [8, 16], strides = [1, 1]} : vector<8x32xf32> to vector<8x16xf32>
    %64 = vector.shape_cast %63 : vector<8x16xf32> to vector<1x8x16xf32>
    %65 = vector.extract_strided_slice %40 {offsets = [8, 0], sizes = [8, 32], strides = [1, 1]} : vector<16x32xf32> to vector<8x32xf32>
    %66 = vector.extract_strided_slice %65 {offsets = [0, 0], sizes = [8, 16], strides = [1, 1]} : vector<8x32xf32> to vector<8x16xf32>
    %67 = vector.shape_cast %66 : vector<8x16xf32> to vector<1x8x16xf32>
    %68 = vector.extract_strided_slice %65 {offsets = [0, 16], sizes = [8, 16], strides = [1, 1]} : vector<8x32xf32> to vector<8x16xf32>
    %69 = vector.shape_cast %68 : vector<8x16xf32> to vector<1x8x16xf32>
    %70 = tpu.concatenate %62, %64, %67, %69 in 0 : vector<1x8x16xf32>, vector<1x8x16xf32>, vector<1x8x16xf32>, vector<1x8x16xf32> -> vector<4x8x16xf32>
    %71 = arith.truncf %70 : vector<4x8x16xf32> to vector<4x8x16xbf16>
    %72 = vector.extract_strided_slice %47 {offsets = [0, 0], sizes = [8, 32], strides = [1, 1]} : vector<16x32xf32> to vector<8x32xf32>
    %73 = vector.extract_strided_slice %72 {offsets = [0, 0], sizes = [8, 16], strides = [1, 1]} : vector<8x32xf32> to vector<8x16xf32>
    %74 = vector.shape_cast %73 : vector<8x16xf32> to vector<1x8x16xf32>
    %75 = vector.extract_strided_slice %72 {offsets = [0, 16], sizes = [8, 16], strides = [1, 1]} : vector<8x32xf32> to vector<8x16xf32>
    %76 = vector.shape_cast %75 : vector<8x16xf32> to vector<1x8x16xf32>
    %77 = vector.extract_strided_slice %47 {offsets = [8, 0], sizes = [8, 32], strides = [1, 1]} : vector<16x32xf32> to vector<8x32xf32>
    %78 = vector.extract_strided_slice %77 {offsets = [0, 0], sizes = [8, 16], strides = [1, 1]} : vector<8x32xf32> to vector<8x16xf32>
    %79 = vector.shape_cast %78 : vector<8x16xf32> to vector<1x8x16xf32>
    %80 = vector.extract_strided_slice %77 {offsets = [0, 16], sizes = [8, 16], strides = [1, 1]} : vector<8x32xf32> to vector<8x16xf32>
    %81 = vector.shape_cast %80 : vector<8x16xf32> to vector<1x8x16xf32>
    %82 = tpu.concatenate %74, %76, %79, %81 in 0 : vector<1x8x16xf32>, vector<1x8x16xf32>, vector<1x8x16xf32>, vector<1x8x16xf32> -> vector<4x8x16xf32>
    %83 = arith.truncf %82 : vector<4x8x16xf32> to vector<4x8x16xbf16>
    "tpu.trace_start"() <{level = 10 : i32, message = "bqd,bkd->bqk"}> : () -> ()
    %cst_33 = arith.constant dense<0.000000e+00> : vector<4x8x8xf32>
    %84 = tpu.matmul %59, %71, %cst_33 {dimension_numbers = #tpu.dot_dimension_numbers<[2], [2], [1], [1], [0, 0, 0, 1, 1, 1], [0], [0]>} : vector<4x8x16xbf16>, vector<4x8x16xbf16>, vector<4x8x8xf32> -> vector<4x8x8xf32>
    "tpu.trace_stop"() : () -> ()
    %cst_34 = arith.constant 2.500000e-01 : f32
    %85 = vector.broadcast %cst_34 : f32 to vector<4x8x8xf32>
    %86 = arith.mulf %84, %85 : vector<4x8x8xf32>
    %87 = arith.addf %86, %25 : vector<4x8x8xf32>
    %cst_35 = arith.constant dense<0xFF800000> : vector<4x8xf32>
    %88 = vector.multi_reduction <maximumf>, %87, %cst_35 [2] : vector<4x8x8xf32> to vector<4x8xf32>
    %89 = vector.shape_cast %88 : vector<4x8xf32> to vector<4x8x1xf32>
    %90 = vector.broadcast %89 : vector<4x8x1xf32> to vector<4x8x8xf32>
    %91 = arith.subf %87, %90 : vector<4x8x8xf32>
    %92 = math.exp %91 : vector<4x8x8xf32>
    %cst_36 = arith.constant dense<0.000000e+00> : vector<4x8xf32>
    %93 = vector.multi_reduction <add>, %92, %cst_36 [2] : vector<4x8x8xf32> to vector<4x8xf32>
    %94 = vector.shape_cast %93 : vector<4x8xf32> to vector<4x8x1xf32>
    %95 = tpu.reciprocal %94 {approx = true} : vector<4x8x1xf32> -> vector<4x8x1xf32>
    %96 = vector.broadcast %95 : vector<4x8x1xf32> to vector<4x8x8xf32>
    %97 = arith.mulf %92, %96 : vector<4x8x8xf32>
    %98 = arith.truncf %97 : vector<4x8x8xf32> to vector<4x8x8xbf16>
    "tpu.trace_start"() <{level = 10 : i32, message = "bqk,bkd->bqd"}> : () -> ()
    %cst_37 = arith.constant dense<0.000000e+00> : vector<4x8x16xf32>
    %99 = tpu.matmul %98, %83, %cst_37 {dimension_numbers = #tpu.dot_dimension_numbers<[2], [1], [1], [2], [0, 0, 0, 1, 1, 2], [0], [0]>} : vector<4x8x8xbf16>, vector<4x8x16xbf16>, vector<4x8x16xf32> -> vector<4x8x16xf32>
    "tpu.trace_stop"() : () -> ()
    %100 = vector.extract_strided_slice %99 {offsets = [0, 0, 0], sizes = [1, 8, 16], strides = [1, 1, 1]} : vector<4x8x16xf32> to vector<1x8x16xf32>
    %101 = vector.shape_cast %100 : vector<1x8x16xf32> to vector<8x16xf32>
    %102 = vector.extract_strided_slice %99 {offsets = [1, 0, 0], sizes = [1, 8, 16], strides = [1, 1, 1]} : vector<4x8x16xf32> to vector<1x8x16xf32>
    %103 = vector.shape_cast %102 : vector<1x8x16xf32> to vector<8x16xf32>
    %104 = tpu.concatenate %101, %103 in 1 : vector<8x16xf32>, vector<8x16xf32> -> vector<8x32xf32>
    %105 = vector.extract_strided_slice %99 {offsets = [2, 0, 0], sizes = [1, 8, 16], strides = [1, 1, 1]} : vector<4x8x16xf32> to vector<1x8x16xf32>
    %106 = vector.shape_cast %105 : vector<1x8x16xf32> to vector<8x16xf32>
    %107 = vector.extract_strided_slice %99 {offsets = [3, 0, 0], sizes = [1, 8, 16], strides = [1, 1, 1]} : vector<4x8x16xf32> to vector<1x8x16xf32>
    %108 = vector.shape_cast %107 : vector<1x8x16xf32> to vector<8x16xf32>
    %109 = tpu.concatenate %106, %108 in 1 : vector<8x16xf32>, vector<8x16xf32> -> vector<8x32xf32>
    %110 = tpu.concatenate %104, %109 in 0 : vector<8x32xf32>, vector<8x32xf32> -> vector<16x32xf32>
    %111 = arith.truncf %110 : vector<16x32xf32> to vector<16x32xbf16>
    %c0_38 = arith.constant 0 : index
    %c0_39 = arith.constant 0 : index
    %c0_40 = arith.constant 0 : index
    %112 = vector.load %arg10[%c0_38, %c0_39, %c0_40] : memref<2x32x32xbf16, #tpu.memory_space<vmem>>, vector<1x32x32xbf16>
    %113 = vector.shape_cast %112 : vector<1x32x32xbf16> to vector<32x32xbf16>
    %cst_41 = arith.constant dense<0.000000e+00> : vector<16x32xf32>
    %114 = tpu.matmul %111, %113, %cst_41 {dimension_numbers = #tpu.dot_dimension_numbers<[1], [0], [0], [1], [0, 0, 1, 1], [], []>} : vector<16x32xbf16>, vector<32x32xbf16>, vector<16x32xf32> -> vector<16x32xf32>
    %c0_42 = arith.constant 0 : index
    %c0_43 = arith.constant 0 : index
    %c0_44 = arith.constant 0 : index
    %115 = vector.load %arg11[%c0_42, %c0_43, %c0_44] : memref<2x1x32xf32, #tpu.memory_space<vmem>>, vector<1x1x32xf32>
    %116 = vector.shape_cast %115 : vector<1x1x32xf32> to vector<1x32xf32>
    %117 = vector.broadcast %116 : vector<1x32xf32> to vector<16x32xf32>
    %118 = arith.addf %114, %117 : vector<16x32xf32>
    %119 = arith.addf %24, %118 : vector<16x32xf32>
    %c0_45 = arith.constant 0 : index
    %c0_46 = arith.constant 0 : index
    %c0_47 = arith.constant 0 : index
    %120 = vector.load %arg12[%c0_45, %c0_46, %c0_47] : memref<2x1x32xf32, #tpu.memory_space<vmem>>, vector<1x1x32xf32>
    %121 = vector.shape_cast %120 : vector<1x1x32xf32> to vector<1x32xf32>
    %c0_48 = arith.constant 0 : index
    %c0_49 = arith.constant 0 : index
    %c0_50 = arith.constant 0 : index
    %122 = vector.load %arg13[%c0_48, %c0_49, %c0_50] : memref<2x1x32xf32, #tpu.memory_space<vmem>>, vector<1x1x32xf32>
    %123 = vector.shape_cast %122 : vector<1x1x32xf32> to vector<1x32xf32>
    %cst_51 = arith.constant dense<0.000000e+00> : vector<16xf32>
    %124 = vector.multi_reduction <add>, %119, %cst_51 [1] : vector<16x32xf32> to vector<16xf32>
    %125 = vector.shape_cast %124 : vector<16xf32> to vector<16x1xf32>
    %cst_52 = arith.constant 3.200000e+01 : f32
    %126 = vector.broadcast %cst_52 : f32 to vector<16x1xf32>
    %127 = arith.divf %125, %126 : vector<16x1xf32>
    %128 = vector.broadcast %127 : vector<16x1xf32> to vector<16x32xf32>
    %129 = arith.subf %119, %128 : vector<16x32xf32>
    %130 = arith.mulf %129, %129 : vector<16x32xf32>
    %cst_53 = arith.constant dense<0.000000e+00> : vector<16xf32>
    %131 = vector.multi_reduction <add>, %130, %cst_53 [1] : vector<16x32xf32> to vector<16xf32>
    %132 = vector.shape_cast %131 : vector<16xf32> to vector<16x1xf32>
    %cst_54 = arith.constant 3.200000e+01 : f32
    %133 = vector.broadcast %cst_54 : f32 to vector<16x1xf32>
    %134 = arith.divf %132, %133 : vector<16x1xf32>
    %135 = vector.broadcast %127 : vector<16x1xf32> to vector<16x32xf32>
    %136 = arith.subf %119, %135 : vector<16x32xf32>
    %cst_55 = arith.constant 9.99999996E-13 : f32
    %137 = vector.broadcast %cst_55 : f32 to vector<16x1xf32>
    %138 = arith.addf %134, %137 : vector<16x1xf32>
    %139 = math.rsqrt %138 : vector<16x1xf32>
    %140 = vector.broadcast %139 : vector<16x1xf32> to vector<16x32xf32>
    %141 = arith.mulf %136, %140 : vector<16x32xf32>
    %142 = vector.broadcast %121 : vector<1x32xf32> to vector<16x32xf32>
    %143 = arith.mulf %141, %142 : vector<16x32xf32>
    %144 = vector.broadcast %123 : vector<1x32xf32> to vector<16x32xf32>
    %145 = arith.addf %143, %144 : vector<16x32xf32>
    %146 = arith.truncf %145 : vector<16x32xf32> to vector<16x32xbf16>
    %c0_56 = arith.constant 0 : index
    %c0_57 = arith.constant 0 : index
    %c0_58 = arith.constant 0 : index
    %147 = vector.load %arg14[%c0_56, %c0_57, %c0_58] : memref<2x32x64xbf16, #tpu.memory_space<vmem>>, vector<1x32x64xbf16>
    %148 = vector.shape_cast %147 : vector<1x32x64xbf16> to vector<32x64xbf16>
    %cst_59 = arith.constant dense<0.000000e+00> : vector<16x64xf32>
    %149 = tpu.matmul %146, %148, %cst_59 {dimension_numbers = #tpu.dot_dimension_numbers<[1], [0], [0], [1], [0, 0, 1, 1], [], []>} : vector<16x32xbf16>, vector<32x64xbf16>, vector<16x64xf32> -> vector<16x64xf32>
    %c0_60 = arith.constant 0 : index
    %c0_61 = arith.constant 0 : index
    %c0_62 = arith.constant 0 : index
    %150 = vector.load %arg15[%c0_60, %c0_61, %c0_62] : memref<2x1x64xf32, #tpu.memory_space<vmem>>, vector<1x1x64xf32>
    %151 = vector.shape_cast %150 : vector<1x1x64xf32> to vector<1x64xf32>
    %152 = vector.broadcast %151 : vector<1x64xf32> to vector<16x64xf32>
    %153 = arith.addf %149, %152 : vector<16x64xf32>
    %cst_63 = arith.constant 5.000000e-01 : f32
    %154 = vector.broadcast %cst_63 : f32 to vector<16x64xf32>
    %155 = arith.mulf %154, %153 : vector<16x64xf32>
    %cst_64 = arith.constant 4.471500e-02 : f32
    %156 = vector.broadcast %cst_64 : f32 to vector<16x64xf32>
    %157 = arith.mulf %156, %153 : vector<16x64xf32>
    %158 = arith.mulf %157, %153 : vector<16x64xf32>
    %159 = arith.mulf %158, %153 : vector<16x64xf32>
    %160 = arith.addf %153, %159 : vector<16x64xf32>
    %cst_65 = arith.constant 0.797884583 : f32
    %161 = vector.broadcast %cst_65 : f32 to vector<16x64xf32>
    %162 = arith.mulf %161, %160 : vector<16x64xf32>
    %163 = math.tanh %162 : vector<16x64xf32>
    %cst_66 = arith.constant 1.000000e+00 : f32
    %164 = vector.broadcast %cst_66 : f32 to vector<16x64xf32>
    %165 = arith.addf %164, %163 : vector<16x64xf32>
    %166 = arith.mulf %155, %165 : vector<16x64xf32>
    %167 = arith.truncf %166 : vector<16x64xf32> to vector<16x64xbf16>
    %c0_67 = arith.constant 0 : index
    %c0_68 = arith.constant 0 : index
    %c0_69 = arith.constant 0 : index
    %168 = vector.load %arg16[%c0_67, %c0_68, %c0_69] : memref<2x64x32xbf16, #tpu.memory_space<vmem>>, vector<1x64x32xbf16>
    %169 = vector.shape_cast %168 : vector<1x64x32xbf16> to vector<64x32xbf16>
    %cst_70 = arith.constant dense<0.000000e+00> : vector<16x32xf32>
    %170 = tpu.matmul %167, %169, %cst_70 {dimension_numbers = #tpu.dot_dimension_numbers<[1], [0], [0], [1], [0, 0, 1, 1], [], []>} : vector<16x64xbf16>, vector<64x32xbf16>, vector<16x32xf32> -> vector<16x32xf32>
    %c0_71 = arith.constant 0 : index
    %c0_72 = arith.constant 0 : index
    %c0_73 = arith.constant 0 : index
    %171 = vector.load %arg17[%c0_71, %c0_72, %c0_73] : memref<2x1x32xf32, #tpu.memory_space<vmem>>, vector<1x1x32xf32>
    %172 = vector.shape_cast %171 : vector<1x1x32xf32> to vector<1x32xf32>
    %173 = vector.broadcast %172 : vector<1x32xf32> to vector<16x32xf32>
    %174 = arith.addf %170, %173 : vector<16x32xf32>
    %175 = arith.addf %145, %174 : vector<16x32xf32>
    %c0_74 = arith.constant 0 : index
    %c0_75 = arith.constant 0 : index
    %c0_76 = arith.constant 0 : index
    %176 = vector.load %arg18[%c0_74, %c0_75, %c0_76] : memref<2x1x32xf32, #tpu.memory_space<vmem>>, vector<1x1x32xf32>
    %177 = vector.shape_cast %176 : vector<1x1x32xf32> to vector<1x32xf32>
    %c0_77 = arith.constant 0 : index
    %c0_78 = arith.constant 0 : index
    %c0_79 = arith.constant 0 : index
    %178 = vector.load %arg19[%c0_77, %c0_78, %c0_79] : memref<2x1x32xf32, #tpu.memory_space<vmem>>, vector<1x1x32xf32>
    %179 = vector.shape_cast %178 : vector<1x1x32xf32> to vector<1x32xf32>
    %cst_80 = arith.constant dense<0.000000e+00> : vector<16xf32>
    %180 = vector.multi_reduction <add>, %175, %cst_80 [1] : vector<16x32xf32> to vector<16xf32>
    %181 = vector.shape_cast %180 : vector<16xf32> to vector<16x1xf32>
    %cst_81 = arith.constant 3.200000e+01 : f32
    %182 = vector.broadcast %cst_81 : f32 to vector<16x1xf32>
    %183 = arith.divf %181, %182 : vector<16x1xf32>
    %184 = vector.broadcast %183 : vector<16x1xf32> to vector<16x32xf32>
    %185 = arith.subf %175, %184 : vector<16x32xf32>
    %186 = arith.mulf %185, %185 : vector<16x32xf32>
    %cst_82 = arith.constant dense<0.000000e+00> : vector<16xf32>
    %187 = vector.multi_reduction <add>, %186, %cst_82 [1] : vector<16x32xf32> to vector<16xf32>
    %188 = vector.shape_cast %187 : vector<16xf32> to vector<16x1xf32>
    %cst_83 = arith.constant 3.200000e+01 : f32
    %189 = vector.broadcast %cst_83 : f32 to vector<16x1xf32>
    %190 = arith.divf %188, %189 : vector<16x1xf32>
    %191 = vector.broadcast %183 : vector<16x1xf32> to vector<16x32xf32>
    %192 = arith.subf %175, %191 : vector<16x32xf32>
    %cst_84 = arith.constant 9.99999996E-13 : f32
    %193 = vector.broadcast %cst_84 : f32 to vector<16x1xf32>
    %194 = arith.addf %190, %193 : vector<16x1xf32>
    %195 = math.rsqrt %194 : vector<16x1xf32>
    %196 = vector.broadcast %195 : vector<16x1xf32> to vector<16x32xf32>
    %197 = arith.mulf %192, %196 : vector<16x32xf32>
    %198 = vector.broadcast %177 : vector<1x32xf32> to vector<16x32xf32>
    %199 = arith.mulf %197, %198 : vector<16x32xf32>
    %200 = vector.broadcast %179 : vector<1x32xf32> to vector<16x32xf32>
    %201 = arith.addf %199, %200 : vector<16x32xf32>
    %202 = arith.truncf %201 : vector<16x32xf32> to vector<16x32xbf16>
    %c1 = arith.constant 1 : index
    %c0_85 = arith.constant 0 : index
    %c0_86 = arith.constant 0 : index
    %203 = vector.load %arg4[%c1, %c0_85, %c0_86] : memref<2x32x32xbf16, #tpu.memory_space<vmem>>, vector<1x32x32xbf16>
    %204 = vector.shape_cast %203 : vector<1x32x32xbf16> to vector<32x32xbf16>
    %cst_87 = arith.constant dense<0.000000e+00> : vector<16x32xf32>
    %205 = tpu.matmul %202, %204, %cst_87 {dimension_numbers = #tpu.dot_dimension_numbers<[1], [0], [0], [1], [0, 0, 1, 1], [], []>} : vector<16x32xbf16>, vector<32x32xbf16>, vector<16x32xf32> -> vector<16x32xf32>
    %c1_88 = arith.constant 1 : index
    %c0_89 = arith.constant 0 : index
    %c0_90 = arith.constant 0 : index
    %206 = vector.load %arg5[%c1_88, %c0_89, %c0_90] : memref<2x1x32xf32, #tpu.memory_space<vmem>>, vector<1x1x32xf32>
    %207 = vector.shape_cast %206 : vector<1x1x32xf32> to vector<1x32xf32>
    %208 = vector.broadcast %207 : vector<1x32xf32> to vector<16x32xf32>
    %209 = arith.addf %205, %208 : vector<16x32xf32>
    %c1_91 = arith.constant 1 : index
    %c0_92 = arith.constant 0 : index
    %c0_93 = arith.constant 0 : index
    %210 = vector.load %arg6[%c1_91, %c0_92, %c0_93] : memref<2x32x32xbf16, #tpu.memory_space<vmem>>, vector<1x32x32xbf16>
    %211 = vector.shape_cast %210 : vector<1x32x32xbf16> to vector<32x32xbf16>
    %cst_94 = arith.constant dense<0.000000e+00> : vector<16x32xf32>
    %212 = tpu.matmul %202, %211, %cst_94 {dimension_numbers = #tpu.dot_dimension_numbers<[1], [0], [0], [1], [0, 0, 1, 1], [], []>} : vector<16x32xbf16>, vector<32x32xbf16>, vector<16x32xf32> -> vector<16x32xf32>
    %c1_95 = arith.constant 1 : index
    %c0_96 = arith.constant 0 : index
    %c0_97 = arith.constant 0 : index
    %213 = vector.load %arg7[%c1_95, %c0_96, %c0_97] : memref<2x1x32xf32, #tpu.memory_space<vmem>>, vector<1x1x32xf32>
    %214 = vector.shape_cast %213 : vector<1x1x32xf32> to vector<1x32xf32>
    %215 = vector.broadcast %214 : vector<1x32xf32> to vector<16x32xf32>
    %216 = arith.addf %212, %215 : vector<16x32xf32>
    %c1_98 = arith.constant 1 : index
    %c0_99 = arith.constant 0 : index
    %c0_100 = arith.constant 0 : index
    %217 = vector.load %arg8[%c1_98, %c0_99, %c0_100] : memref<2x32x32xbf16, #tpu.memory_space<vmem>>, vector<1x32x32xbf16>
    %218 = vector.shape_cast %217 : vector<1x32x32xbf16> to vector<32x32xbf16>
    %cst_101 = arith.constant dense<0.000000e+00> : vector<16x32xf32>
    %219 = tpu.matmul %202, %218, %cst_101 {dimension_numbers = #tpu.dot_dimension_numbers<[1], [0], [0], [1], [0, 0, 1, 1], [], []>} : vector<16x32xbf16>, vector<32x32xbf16>, vector<16x32xf32> -> vector<16x32xf32>
    %c1_102 = arith.constant 1 : index
    %c0_103 = arith.constant 0 : index
    %c0_104 = arith.constant 0 : index
    %220 = vector.load %arg9[%c1_102, %c0_103, %c0_104] : memref<2x1x32xf32, #tpu.memory_space<vmem>>, vector<1x1x32xf32>
    %221 = vector.shape_cast %220 : vector<1x1x32xf32> to vector<1x32xf32>
    %222 = vector.broadcast %221 : vector<1x32xf32> to vector<16x32xf32>
    %223 = arith.addf %219, %222 : vector<16x32xf32>
    %224 = vector.extract_strided_slice %209 {offsets = [0, 0], sizes = [8, 32], strides = [1, 1]} : vector<16x32xf32> to vector<8x32xf32>
    %225 = vector.extract_strided_slice %224 {offsets = [0, 0], sizes = [8, 16], strides = [1, 1]} : vector<8x32xf32> to vector<8x16xf32>
    %226 = vector.shape_cast %225 : vector<8x16xf32> to vector<1x8x16xf32>
    %227 = vector.extract_strided_slice %224 {offsets = [0, 16], sizes = [8, 16], strides = [1, 1]} : vector<8x32xf32> to vector<8x16xf32>
    %228 = vector.shape_cast %227 : vector<8x16xf32> to vector<1x8x16xf32>
    %229 = vector.extract_strided_slice %209 {offsets = [8, 0], sizes = [8, 32], strides = [1, 1]} : vector<16x32xf32> to vector<8x32xf32>
    %230 = vector.extract_strided_slice %229 {offsets = [0, 0], sizes = [8, 16], strides = [1, 1]} : vector<8x32xf32> to vector<8x16xf32>
    %231 = vector.shape_cast %230 : vector<8x16xf32> to vector<1x8x16xf32>
    %232 = vector.extract_strided_slice %229 {offsets = [0, 16], sizes = [8, 16], strides = [1, 1]} : vector<8x32xf32> to vector<8x16xf32>
    %233 = vector.shape_cast %232 : vector<8x16xf32> to vector<1x8x16xf32>
    %234 = tpu.concatenate %226, %228, %231, %233 in 0 : vector<1x8x16xf32>, vector<1x8x16xf32>, vector<1x8x16xf32>, vector<1x8x16xf32> -> vector<4x8x16xf32>
    %235 = arith.truncf %234 : vector<4x8x16xf32> to vector<4x8x16xbf16>
    %236 = vector.extract_strided_slice %216 {offsets = [0, 0], sizes = [8, 32], strides = [1, 1]} : vector<16x32xf32> to vector<8x32xf32>
    %237 = vector.extract_strided_slice %236 {offsets = [0, 0], sizes = [8, 16], strides = [1, 1]} : vector<8x32xf32> to vector<8x16xf32>
    %238 = vector.shape_cast %237 : vector<8x16xf32> to vector<1x8x16xf32>
    %239 = vector.extract_strided_slice %236 {offsets = [0, 16], sizes = [8, 16], strides = [1, 1]} : vector<8x32xf32> to vector<8x16xf32>
    %240 = vector.shape_cast %239 : vector<8x16xf32> to vector<1x8x16xf32>
    %241 = vector.extract_strided_slice %216 {offsets = [8, 0], sizes = [8, 32], strides = [1, 1]} : vector<16x32xf32> to vector<8x32xf32>
    %242 = vector.extract_strided_slice %241 {offsets = [0, 0], sizes = [8, 16], strides = [1, 1]} : vector<8x32xf32> to vector<8x16xf32>
    %243 = vector.shape_cast %242 : vector<8x16xf32> to vector<1x8x16xf32>
    %244 = vector.extract_strided_slice %241 {offsets = [0, 16], sizes = [8, 16], strides = [1, 1]} : vector<8x32xf32> to vector<8x16xf32>
    %245 = vector.shape_cast %244 : vector<8x16xf32> to vector<1x8x16xf32>
    %246 = tpu.concatenate %238, %240, %243, %245 in 0 : vector<1x8x16xf32>, vector<1x8x16xf32>, vector<1x8x16xf32>, vector<1x8x16xf32> -> vector<4x8x16xf32>
    %247 = arith.truncf %246 : vector<4x8x16xf32> to vector<4x8x16xbf16>
    %248 = vector.extract_strided_slice %223 {offsets = [0, 0], sizes = [8, 32], strides = [1, 1]} : vector<16x32xf32> to vector<8x32xf32>
    %249 = vector.extract_strided_slice %248 {offsets = [0, 0], sizes = [8, 16], strides = [1, 1]} : vector<8x32xf32> to vector<8x16xf32>
    %250 = vector.shape_cast %249 : vector<8x16xf32> to vector<1x8x16xf32>
    %251 = vector.extract_strided_slice %248 {offsets = [0, 16], sizes = [8, 16], strides = [1, 1]} : vector<8x32xf32> to vector<8x16xf32>
    %252 = vector.shape_cast %251 : vector<8x16xf32> to vector<1x8x16xf32>
    %253 = vector.extract_strided_slice %223 {offsets = [8, 0], sizes = [8, 32], strides = [1, 1]} : vector<16x32xf32> to vector<8x32xf32>
    %254 = vector.extract_strided_slice %253 {offsets = [0, 0], sizes = [8, 16], strides = [1, 1]} : vector<8x32xf32> to vector<8x16xf32>
    %255 = vector.shape_cast %254 : vector<8x16xf32> to vector<1x8x16xf32>
    %256 = vector.extract_strided_slice %253 {offsets = [0, 16], sizes = [8, 16], strides = [1, 1]} : vector<8x32xf32> to vector<8x16xf32>
    %257 = vector.shape_cast %256 : vector<8x16xf32> to vector<1x8x16xf32>
    %258 = tpu.concatenate %250, %252, %255, %257 in 0 : vector<1x8x16xf32>, vector<1x8x16xf32>, vector<1x8x16xf32>, vector<1x8x16xf32> -> vector<4x8x16xf32>
    %259 = arith.truncf %258 : vector<4x8x16xf32> to vector<4x8x16xbf16>
    "tpu.trace_start"() <{level = 10 : i32, message = "bqd,bkd->bqk"}> : () -> ()
    %cst_105 = arith.constant dense<0.000000e+00> : vector<4x8x8xf32>
    %260 = tpu.matmul %235, %247, %cst_105 {dimension_numbers = #tpu.dot_dimension_numbers<[2], [2], [1], [1], [0, 0, 0, 1, 1, 1], [0], [0]>} : vector<4x8x16xbf16>, vector<4x8x16xbf16>, vector<4x8x8xf32> -> vector<4x8x8xf32>
    "tpu.trace_stop"() : () -> ()
    %cst_106 = arith.constant 2.500000e-01 : f32
    %261 = vector.broadcast %cst_106 : f32 to vector<4x8x8xf32>
    %262 = arith.mulf %260, %261 : vector<4x8x8xf32>
    %263 = arith.addf %262, %25 : vector<4x8x8xf32>
    %cst_107 = arith.constant dense<0xFF800000> : vector<4x8xf32>
    %264 = vector.multi_reduction <maximumf>, %263, %cst_107 [2] : vector<4x8x8xf32> to vector<4x8xf32>
    %265 = vector.shape_cast %264 : vector<4x8xf32> to vector<4x8x1xf32>
    %266 = vector.broadcast %265 : vector<4x8x1xf32> to vector<4x8x8xf32>
    %267 = arith.subf %263, %266 : vector<4x8x8xf32>
    %268 = math.exp %267 : vector<4x8x8xf32>
    %cst_108 = arith.constant dense<0.000000e+00> : vector<4x8xf32>
    %269 = vector.multi_reduction <add>, %268, %cst_108 [2] : vector<4x8x8xf32> to vector<4x8xf32>
    %270 = vector.shape_cast %269 : vector<4x8xf32> to vector<4x8x1xf32>
    %271 = tpu.reciprocal %270 {approx = true} : vector<4x8x1xf32> -> vector<4x8x1xf32>
    %272 = vector.broadcast %271 : vector<4x8x1xf32> to vector<4x8x8xf32>
    %273 = arith.mulf %268, %272 : vector<4x8x8xf32>
    %274 = arith.truncf %273 : vector<4x8x8xf32> to vector<4x8x8xbf16>
    "tpu.trace_start"() <{level = 10 : i32, message = "bqk,bkd->bqd"}> : () -> ()
    %cst_109 = arith.constant dense<0.000000e+00> : vector<4x8x16xf32>
    %275 = tpu.matmul %274, %259, %cst_109 {dimension_numbers = #tpu.dot_dimension_numbers<[2], [1], [1], [2], [0, 0, 0, 1, 1, 2], [0], [0]>} : vector<4x8x8xbf16>, vector<4x8x16xbf16>, vector<4x8x16xf32> -> vector<4x8x16xf32>
    "tpu.trace_stop"() : () -> ()
    %276 = vector.extract_strided_slice %275 {offsets = [0, 0, 0], sizes = [1, 8, 16], strides = [1, 1, 1]} : vector<4x8x16xf32> to vector<1x8x16xf32>
    %277 = vector.shape_cast %276 : vector<1x8x16xf32> to vector<8x16xf32>
    %278 = vector.extract_strided_slice %275 {offsets = [1, 0, 0], sizes = [1, 8, 16], strides = [1, 1, 1]} : vector<4x8x16xf32> to vector<1x8x16xf32>
    %279 = vector.shape_cast %278 : vector<1x8x16xf32> to vector<8x16xf32>
    %280 = tpu.concatenate %277, %279 in 1 : vector<8x16xf32>, vector<8x16xf32> -> vector<8x32xf32>
    %281 = vector.extract_strided_slice %275 {offsets = [2, 0, 0], sizes = [1, 8, 16], strides = [1, 1, 1]} : vector<4x8x16xf32> to vector<1x8x16xf32>
    %282 = vector.shape_cast %281 : vector<1x8x16xf32> to vector<8x16xf32>
    %283 = vector.extract_strided_slice %275 {offsets = [3, 0, 0], sizes = [1, 8, 16], strides = [1, 1, 1]} : vector<4x8x16xf32> to vector<1x8x16xf32>
    %284 = vector.shape_cast %283 : vector<1x8x16xf32> to vector<8x16xf32>
    %285 = tpu.concatenate %282, %284 in 1 : vector<8x16xf32>, vector<8x16xf32> -> vector<8x32xf32>
    %286 = tpu.concatenate %280, %285 in 0 : vector<8x32xf32>, vector<8x32xf32> -> vector<16x32xf32>
    %287 = arith.truncf %286 : vector<16x32xf32> to vector<16x32xbf16>
    %c1_110 = arith.constant 1 : index
    %c0_111 = arith.constant 0 : index
    %c0_112 = arith.constant 0 : index
    %288 = vector.load %arg10[%c1_110, %c0_111, %c0_112] : memref<2x32x32xbf16, #tpu.memory_space<vmem>>, vector<1x32x32xbf16>
    %289 = vector.shape_cast %288 : vector<1x32x32xbf16> to vector<32x32xbf16>
    %cst_113 = arith.constant dense<0.000000e+00> : vector<16x32xf32>
    %290 = tpu.matmul %287, %289, %cst_113 {dimension_numbers = #tpu.dot_dimension_numbers<[1], [0], [0], [1], [0, 0, 1, 1], [], []>} : vector<16x32xbf16>, vector<32x32xbf16>, vector<16x32xf32> -> vector<16x32xf32>
    %c1_114 = arith.constant 1 : index
    %c0_115 = arith.constant 0 : index
    %c0_116 = arith.constant 0 : index
    %291 = vector.load %arg11[%c1_114, %c0_115, %c0_116] : memref<2x1x32xf32, #tpu.memory_space<vmem>>, vector<1x1x32xf32>
    %292 = vector.shape_cast %291 : vector<1x1x32xf32> to vector<1x32xf32>
    %293 = vector.broadcast %292 : vector<1x32xf32> to vector<16x32xf32>
    %294 = arith.addf %290, %293 : vector<16x32xf32>
    %295 = arith.addf %201, %294 : vector<16x32xf32>
    %c1_117 = arith.constant 1 : index
    %c0_118 = arith.constant 0 : index
    %c0_119 = arith.constant 0 : index
    %296 = vector.load %arg12[%c1_117, %c0_118, %c0_119] : memref<2x1x32xf32, #tpu.memory_space<vmem>>, vector<1x1x32xf32>
    %297 = vector.shape_cast %296 : vector<1x1x32xf32> to vector<1x32xf32>
    %c1_120 = arith.constant 1 : index
    %c0_121 = arith.constant 0 : index
    %c0_122 = arith.constant 0 : index
    %298 = vector.load %arg13[%c1_120, %c0_121, %c0_122] : memref<2x1x32xf32, #tpu.memory_space<vmem>>, vector<1x1x32xf32>
    %299 = vector.shape_cast %298 : vector<1x1x32xf32> to vector<1x32xf32>
    %cst_123 = arith.constant dense<0.000000e+00> : vector<16xf32>
    %300 = vector.multi_reduction <add>, %295, %cst_123 [1] : vector<16x32xf32> to vector<16xf32>
    %301 = vector.shape_cast %300 : vector<16xf32> to vector<16x1xf32>
    %cst_124 = arith.constant 3.200000e+01 : f32
    %302 = vector.broadcast %cst_124 : f32 to vector<16x1xf32>
    %303 = arith.divf %301, %302 : vector<16x1xf32>
    %304 = vector.broadcast %303 : vector<16x1xf32> to vector<16x32xf32>
    %305 = arith.subf %295, %304 : vector<16x32xf32>
    %306 = arith.mulf %305, %305 : vector<16x32xf32>
    %cst_125 = arith.constant dense<0.000000e+00> : vector<16xf32>
    %307 = vector.multi_reduction <add>, %306, %cst_125 [1] : vector<16x32xf32> to vector<16xf32>
    %308 = vector.shape_cast %307 : vector<16xf32> to vector<16x1xf32>
    %cst_126 = arith.constant 3.200000e+01 : f32
    %309 = vector.broadcast %cst_126 : f32 to vector<16x1xf32>
    %310 = arith.divf %308, %309 : vector<16x1xf32>
    %311 = vector.broadcast %303 : vector<16x1xf32> to vector<16x32xf32>
    %312 = arith.subf %295, %311 : vector<16x32xf32>
    %cst_127 = arith.constant 9.99999996E-13 : f32
    %313 = vector.broadcast %cst_127 : f32 to vector<16x1xf32>
    %314 = arith.addf %310, %313 : vector<16x1xf32>
    %315 = math.rsqrt %314 : vector<16x1xf32>
    %316 = vector.broadcast %315 : vector<16x1xf32> to vector<16x32xf32>
    %317 = arith.mulf %312, %316 : vector<16x32xf32>
    %318 = vector.broadcast %297 : vector<1x32xf32> to vector<16x32xf32>
    %319 = arith.mulf %317, %318 : vector<16x32xf32>
    %320 = vector.broadcast %299 : vector<1x32xf32> to vector<16x32xf32>
    %321 = arith.addf %319, %320 : vector<16x32xf32>
    %322 = arith.truncf %321 : vector<16x32xf32> to vector<16x32xbf16>
    %c1_128 = arith.constant 1 : index
    %c0_129 = arith.constant 0 : index
    %c0_130 = arith.constant 0 : index
    %323 = vector.load %arg14[%c1_128, %c0_129, %c0_130] : memref<2x32x64xbf16, #tpu.memory_space<vmem>>, vector<1x32x64xbf16>
    %324 = vector.shape_cast %323 : vector<1x32x64xbf16> to vector<32x64xbf16>
    %cst_131 = arith.constant dense<0.000000e+00> : vector<16x64xf32>
    %325 = tpu.matmul %322, %324, %cst_131 {dimension_numbers = #tpu.dot_dimension_numbers<[1], [0], [0], [1], [0, 0, 1, 1], [], []>} : vector<16x32xbf16>, vector<32x64xbf16>, vector<16x64xf32> -> vector<16x64xf32>
    %c1_132 = arith.constant 1 : index
    %c0_133 = arith.constant 0 : index
    %c0_134 = arith.constant 0 : index
    %326 = vector.load %arg15[%c1_132, %c0_133, %c0_134] : memref<2x1x64xf32, #tpu.memory_space<vmem>>, vector<1x1x64xf32>
    %327 = vector.shape_cast %326 : vector<1x1x64xf32> to vector<1x64xf32>
    %328 = vector.broadcast %327 : vector<1x64xf32> to vector<16x64xf32>
    %329 = arith.addf %325, %328 : vector<16x64xf32>
    %cst_135 = arith.constant 5.000000e-01 : f32
    %330 = vector.broadcast %cst_135 : f32 to vector<16x64xf32>
    %331 = arith.mulf %330, %329 : vector<16x64xf32>
    %cst_136 = arith.constant 4.471500e-02 : f32
    %332 = vector.broadcast %cst_136 : f32 to vector<16x64xf32>
    %333 = arith.mulf %332, %329 : vector<16x64xf32>
    %334 = arith.mulf %333, %329 : vector<16x64xf32>
    %335 = arith.mulf %334, %329 : vector<16x64xf32>
    %336 = arith.addf %329, %335 : vector<16x64xf32>
    %cst_137 = arith.constant 0.797884583 : f32
    %337 = vector.broadcast %cst_137 : f32 to vector<16x64xf32>
    %338 = arith.mulf %337, %336 : vector<16x64xf32>
    %339 = math.tanh %338 : vector<16x64xf32>
    %cst_138 = arith.constant 1.000000e+00 : f32
    %340 = vector.broadcast %cst_138 : f32 to vector<16x64xf32>
    %341 = arith.addf %340, %339 : vector<16x64xf32>
    %342 = arith.mulf %331, %341 : vector<16x64xf32>
    %343 = arith.truncf %342 : vector<16x64xf32> to vector<16x64xbf16>
    %c1_139 = arith.constant 1 : index
    %c0_140 = arith.constant 0 : index
    %c0_141 = arith.constant 0 : index
    %344 = vector.load %arg16[%c1_139, %c0_140, %c0_141] : memref<2x64x32xbf16, #tpu.memory_space<vmem>>, vector<1x64x32xbf16>
    %345 = vector.shape_cast %344 : vector<1x64x32xbf16> to vector<64x32xbf16>
    %cst_142 = arith.constant dense<0.000000e+00> : vector<16x32xf32>
    %346 = tpu.matmul %343, %345, %cst_142 {dimension_numbers = #tpu.dot_dimension_numbers<[1], [0], [0], [1], [0, 0, 1, 1], [], []>} : vector<16x64xbf16>, vector<64x32xbf16>, vector<16x32xf32> -> vector<16x32xf32>
    %c1_143 = arith.constant 1 : index
    %c0_144 = arith.constant 0 : index
    %c0_145 = arith.constant 0 : index
    %347 = vector.load %arg17[%c1_143, %c0_144, %c0_145] : memref<2x1x32xf32, #tpu.memory_space<vmem>>, vector<1x1x32xf32>
    %348 = vector.shape_cast %347 : vector<1x1x32xf32> to vector<1x32xf32>
    %349 = vector.broadcast %348 : vector<1x32xf32> to vector<16x32xf32>
    %350 = arith.addf %346, %349 : vector<16x32xf32>
    %351 = arith.addf %321, %350 : vector<16x32xf32>
    %c1_146 = arith.constant 1 : index
    %c0_147 = arith.constant 0 : index
    %c0_148 = arith.constant 0 : index
    %352 = vector.load %arg18[%c1_146, %c0_147, %c0_148] : memref<2x1x32xf32, #tpu.memory_space<vmem>>, vector<1x1x32xf32>
    %353 = vector.shape_cast %352 : vector<1x1x32xf32> to vector<1x32xf32>
    %c1_149 = arith.constant 1 : index
    %c0_150 = arith.constant 0 : index
    %c0_151 = arith.constant 0 : index
    %354 = vector.load %arg19[%c1_149, %c0_150, %c0_151] : memref<2x1x32xf32, #tpu.memory_space<vmem>>, vector<1x1x32xf32>
    %355 = vector.shape_cast %354 : vector<1x1x32xf32> to vector<1x32xf32>
    %cst_152 = arith.constant dense<0.000000e+00> : vector<16xf32>
    %356 = vector.multi_reduction <add>, %351, %cst_152 [1] : vector<16x32xf32> to vector<16xf32>
    %357 = vector.shape_cast %356 : vector<16xf32> to vector<16x1xf32>
    %cst_153 = arith.constant 3.200000e+01 : f32
    %358 = vector.broadcast %cst_153 : f32 to vector<16x1xf32>
    %359 = arith.divf %357, %358 : vector<16x1xf32>
    %360 = vector.broadcast %359 : vector<16x1xf32> to vector<16x32xf32>
    %361 = arith.subf %351, %360 : vector<16x32xf32>
    %362 = arith.mulf %361, %361 : vector<16x32xf32>
    %cst_154 = arith.constant dense<0.000000e+00> : vector<16xf32>
    %363 = vector.multi_reduction <add>, %362, %cst_154 [1] : vector<16x32xf32> to vector<16xf32>
    %364 = vector.shape_cast %363 : vector<16xf32> to vector<16x1xf32>
    %cst_155 = arith.constant 3.200000e+01 : f32
    %365 = vector.broadcast %cst_155 : f32 to vector<16x1xf32>
    %366 = arith.divf %364, %365 : vector<16x1xf32>
    %367 = vector.broadcast %359 : vector<16x1xf32> to vector<16x32xf32>
    %368 = arith.subf %351, %367 : vector<16x32xf32>
    %cst_156 = arith.constant 9.99999996E-13 : f32
    %369 = vector.broadcast %cst_156 : f32 to vector<16x1xf32>
    %370 = arith.addf %366, %369 : vector<16x1xf32>
    %371 = math.rsqrt %370 : vector<16x1xf32>
    %372 = vector.broadcast %371 : vector<16x1xf32> to vector<16x32xf32>
    %373 = arith.mulf %368, %372 : vector<16x32xf32>
    %374 = vector.broadcast %353 : vector<1x32xf32> to vector<16x32xf32>
    %375 = arith.mulf %373, %374 : vector<16x32xf32>
    %376 = vector.broadcast %355 : vector<1x32xf32> to vector<16x32xf32>
    %377 = arith.addf %375, %376 : vector<16x32xf32>
    %378 = vector.extract_strided_slice %377 {offsets = [0, 0], sizes = [1, 32], strides = [1, 1]} : vector<16x32xf32> to vector<1x32xf32>
    %379 = vector.extract_strided_slice %377 {offsets = [8, 0], sizes = [1, 32], strides = [1, 1]} : vector<16x32xf32> to vector<1x32xf32>
    %380 = tpu.concatenate %378, %379 in 0 : vector<1x32xf32>, vector<1x32xf32> -> vector<2x32xf32>
    %381 = arith.truncf %380 : vector<2x32xf32> to vector<2x32xbf16>
    %c0_157 = arith.constant 0 : index
    %c0_158 = arith.constant 0 : index
    %382 = vector.load %arg20[%c0_157, %c0_158] : memref<32x32xbf16, #tpu.memory_space<vmem>>, vector<32x32xbf16>
    %cst_159 = arith.constant dense<0.000000e+00> : vector<2x32xf32>
    %383 = tpu.matmul %381, %382, %cst_159 {dimension_numbers = #tpu.dot_dimension_numbers<[1], [0], [0], [1], [0, 0, 1, 1], [], []>} : vector<2x32xbf16>, vector<32x32xbf16>, vector<2x32xf32> -> vector<2x32xf32>
    %c0_160 = arith.constant 0 : index
    %c0_161 = arith.constant 0 : index
    %384 = vector.load %arg21[%c0_160, %c0_161] : memref<1x32xf32, #tpu.memory_space<vmem>>, vector<1x32xf32>
    %385 = vector.broadcast %384 : vector<1x32xf32> to vector<2x32xf32>
    %386 = arith.addf %383, %385 : vector<2x32xf32>
    %387 = math.tanh %386 : vector<2x32xf32>
    %388 = arith.truncf %387 : vector<2x32xf32> to vector<2x32xbf16>
    %c0_162 = arith.constant 0 : index
    %c0_163 = arith.constant 0 : index
    %389 = vector.load %arg22[%c0_162, %c0_163] : memref<32x32xbf16, #tpu.memory_space<vmem>>, vector<32x32xbf16>
    %cst_164 = arith.constant dense<0.000000e+00> : vector<2x32xf32>
    %390 = tpu.matmul %388, %389, %cst_164 {dimension_numbers = #tpu.dot_dimension_numbers<[1], [0], [0], [1], [0, 0, 1, 1], [], []>} : vector<2x32xbf16>, vector<32x32xbf16>, vector<2x32xf32> -> vector<2x32xf32>
    %c0_165 = arith.constant 0 : index
    %c0_166 = arith.constant 0 : index
    %391 = vector.load %arg23[%c0_165, %c0_166] : memref<1x32xf32, #tpu.memory_space<vmem>>, vector<1x32xf32>
    %392 = vector.broadcast %391 : vector<1x32xf32> to vector<2x32xf32>
    %393 = arith.addf %390, %392 : vector<2x32xf32>
    %cst_167 = arith.constant 0.000000e+00 : f32
    %394 = vector.broadcast %cst_167 : f32 to vector<2x32xf32>
    %395 = arith.maximumf %393, %394 : vector<2x32xf32>
    %396 = arith.truncf %395 : vector<2x32xf32> to vector<2x32xbf16>
    %c0_168 = arith.constant 0 : index
    %c0_169 = arith.constant 0 : index
    %397 = vector.load %arg24[%c0_168, %c0_169] : memref<32x4xbf16, #tpu.memory_space<vmem>>, vector<32x4xbf16>
    %cst_170 = arith.constant dense<0.000000e+00> : vector<2x4xf32>
    %398 = tpu.matmul %396, %397, %cst_170 {dimension_numbers = #tpu.dot_dimension_numbers<[1], [0], [0], [1], [0, 0, 1, 1], [], []>} : vector<2x32xbf16>, vector<32x4xbf16>, vector<2x4xf32> -> vector<2x4xf32>
    %c0_171 = arith.constant 0 : index
    %c0_172 = arith.constant 0 : index
    %399 = vector.load %arg25[%c0_171, %c0_172] : memref<1x4xf32, #tpu.memory_space<vmem>>, vector<1x4xf32>
    %400 = vector.broadcast %399 : vector<1x4xf32> to vector<2x4xf32>
    %401 = arith.addf %398, %400 : vector<2x4xf32>
    %cst_173 = arith.constant dense<0xFF800000> : vector<2xf32>
    %402 = vector.multi_reduction <maximumf>, %401, %cst_173 [1] : vector<2x4xf32> to vector<2xf32>
    %403 = vector.shape_cast %402 : vector<2xf32> to vector<2x1xf32>
    %404 = vector.broadcast %403 : vector<2x1xf32> to vector<2x4xf32>
    %405 = arith.subf %401, %404 : vector<2x4xf32>
    %406 = math.exp %405 : vector<2x4xf32>
    %cst_174 = arith.constant dense<0.000000e+00> : vector<2xf32>
    %407 = vector.multi_reduction <add>, %406, %cst_174 [1] : vector<2x4xf32> to vector<2xf32>
    %408 = vector.shape_cast %407 : vector<2xf32> to vector<2x1xf32>
    %409 = vector.broadcast %408 : vector<2x1xf32> to vector<2x4xf32>
    %410 = arith.divf %406, %409 : vector<2x4xf32>
    %c0_175 = arith.constant 0 : index
    %c0_176 = arith.constant 0 : index
    %411 = vector.load %arg26[%c0_175, %c0_176] : memref<2x4xf32, #tpu.memory_space<vmem>>, vector<2x4xf32>
    tpu.vector_store %arg26[%c0_175, %c0_176], %410 {strides = array<i32>} : memref<2x4xf32, #tpu.memory_space<vmem>>, vector<2x4xf32>,
    return
  }
}

</mosaic_0001>

<bundles_post_ra>
// kernel: bert_plus_mlp_forward.1
= control target key start
LH: loop header
LB: loop body
LE: loop exit
PB: predicated region body
PF: predicated region fallthrough
CT: control target
= control target key end

     0   :  { %s3579_s0 = inlined_call_operand.vmem [shape: f32[16,32], index: 0, kind: input, shape index: {}]   ;;  %s3580_s1 = inlined_call_operand.vmem [shape: f32[4,8,8], index: 1, kind: input, shape index: {}]   ;;  %s3581_s2 = inlined_call_operand.vmem [shape: f32[1,32], index: 2, kind: input, shape index: {}]   ;;  %s3582_s3 = inlined_call_operand.vmem [shape: f32[1,32], index: 3, kind: input, shape index: {}]   ;;  %s3583_s4 = inlined_call_operand.vmem [shape: bf16[2,32,32], index: 4, kind: input, shape index: {}]   ;;  %s3584_s5 = inlined_call_operand.vmem [shape: f32[2,1,32], index: 5, kind: input, shape index: {}]   ;;  %s3585_s6 = inlined_call_operand.vmem [shape: bf16[2,32,32], index: 6, kind: input, shape index: {}]   ;;  %s3586_s7 = inlined_call_operand.vmem [shape: f32[2,1,32], index: 7, kind: input, shape index: {}]   ;;  %s3587_s8 = inlined_call_operand.vmem [shape: bf16[2,32,32], index: 8, kind: input, shape index: {}]   ;;  %s3588_s9 = inlined_call_operand.vmem [shape: f32[2,1,32], index: 9, kind: input, shape index: {}]   ;;  %s3589_s10 = inlined_call_operand.vmem [shape: bf16[2,32,32], index: 10, kind: input, shape index: {}]   ;;  %s3590_s11 = inlined_call_operand.vmem [shape: f32[2,1,32], index: 11, kind: input, shape index: {}]   ;;  %s3591_s12 = inlined_call_operand.vmem [shape: f32[2,1,32], index: 12, kind: input, shape index: {}]   ;;  %s3592_s13 = inlined_call_operand.vmem [shape: f32[2,1,32], index: 13, kind: input, shape index: {}]   ;;  %s3593_s14 = inlined_call_operand.vmem [shape: bf16[2,32,64], index: 14, kind: input, shape index: {}]   ;;  %s3594_s15 = inlined_call_operand.vmem [shape: f32[2,1,64], index: 15, kind: input, shape index: {}]   ;;  %s3595_s16 = inlined_call_operand.vmem [shape: bf16[2,64,32], index: 16, kind: input, shape index: {}]   ;;  %s3596_s17 = inlined_call_operand.vmem [shape: f32[2,1,32], index: 17, kind: input, shape index: {}]   ;;  %s3597_s18 = inlined_call_operand.vmem [shape: f32[2,1,32], index: 18, kind: input, shape index: {}]   ;;  %s3598_s19 = inlined_call_operand.vmem [shape: f32[2,1,32], index: 19, kind: input, shape index: {}]   ;;  %s3599_s20 = inlined_call_operand.vmem [shape: bf16[32,32], index: 20, kind: input, shape index: {}]   ;;  %s3600_s21 = inlined_call_operand.vmem [shape: f32[1,32], index: 21, kind: input, shape index: {}]   ;;  %s3601_s22 = inlined_call_operand.vmem [shape: bf16[32,32], index: 22, kind: input, shape index: {}]   ;;  %s3602_s23 = inlined_call_operand.vmem [shape: f32[1,32], index: 23, kind: input, shape index: {}]   ;;  %s3603_s24 = inlined_call_operand.vmem [shape: bf16[32,4], index: 24, kind: input, shape index: {}]   ;;  %s3604_s25 = inlined_call_operand.vmem [shape: f32[1,4], index: 25, kind: input, shape index: {}]   ;;  %s3605_s26 = inlined_call_operand.hbm [shape: f32[2,4], index: 26, kind: output, shape index: {}]  }
   0x1   :  { %3618 = sst [smem:[#allocation5_spill]] %s3579_s0 }
   0x2   :  { %3619 = sst [smem:[#allocation6_spill]] %s3580_s1 }
   0x3   :  { %3620 = sst [smem:[#allocation7_spill]] %s3581_s2 }
   0x4   :  { %3621 = sst [smem:[#allocation8_spill]] %s3582_s3 }
   0x5   :  { %3622 = sst [smem:[#allocation9_spill]] %s3583_s4 }
   0x6   :  { %3623 = sst [smem:[#allocation10_spill]] %s3584_s5 }
   0x7   :  { %3624 = sst [smem:[#allocation11_spill]] %s3585_s6 }
   0x8   :  { %3625 = sst [smem:[#allocation12_spill]] %s3586_s7 }
   0x9   :  { %3626 = sst [smem:[#allocation13_spill]] %s3587_s8 }
   0xa   :  { %3627 = sst [smem:[#allocation14_spill]] %s3588_s9 }
   0xb   :  { %3628 = sst [smem:[#allocation15_spill]] %s3589_s10 }
   0xc   :  { %s3629_s7 = sld [smem:[#allocation5_spill]]  ;;  %vm89_vm0 = vcmask 261120  }
  0x12   :  { %v85_v0 = vld [vmem:[%s3629_s7] sm:$0xff]  ;;  %v86_v1 = vld [vmem:[%s3629_s7 + $0x8] sm:$0xff] }
  0x13   :  { %v90_v2 = vsel %vm89_vm0, %v85_v0, 0.0  ;;  %v93_v3 = vsel %vm89_vm0, %v86_v1, 0.0 }
  0x14   :  { %91 = vadd.xlane.f32.xlu0 %v90_v2 }
  0x18   :  { %94 = vadd.xlane.f32.xlu0 %v93_v3 }
  0x19   :  { %31 = vsyncpa [#allocation3], 0  ;;  %s3630_s0 = sld [smem:[#allocation9_spill]]  ;;  %s3631_s2 = sld [smem:[#allocation11_spill]]  ;;  %v2966_v16 = vmov 0.0   ;;  %vm2967_vm1 = vmmov 0  }
  0x1a   :  { %2593 = vmatprep.subr.bf16.mxu0 %v2966_v16  ;;  %2601 = vmatprep.subr.bf16.mxu1 %v2966_v16  ;;  %s3632_s7 = sld [smem:[#allocation7_spill]]  ;;  %s3633_s4 = sld [smem:[#allocation8_spill]]  ;;  %vm369_vm2 = vcmask 130048   ;;  %vm614_vm3 = vcmask 1043456   ;;  %vm562_vm4 = vcmask 64512   ;;  %vm1046_vm5 = vcmask 523264  }
  0x1b   :  { %2597 = vmatprep.mubr.msk.bf16.mxu0 %vm2967_vm1, %v2966_v16  ;;  %2605 = vmatprep.mubr.msk.bf16.mxu1 %vm2967_vm1, %v2966_v16  ;;  %s3634_s30 = sld [smem:[#allocation13_spill]]  ;;  %s3635_s27 = sld [smem:[#allocation12_spill]]  ;;  %vm2152_vm6 = vcmask 1040384   ;;  %vm2357_vm7 = vcmask 25600  }
  0x1c   :  { %s3636_s28 = sld [smem:[#allocation10_spill]]  ;;  %s3616_s8 = smov 112  }
  0x1d   :  { %s3637_s9 = sld [smem:[#allocation14_spill]]  ;;  %s3639_s1 = sld [smem:[#allocation15_spill]] }
  0x1e   :  { %s3638_s6 = sld [smem:[#allocation6_spill]] }
  0x1f   :  { %v2842_v14 = vld [vmem:[%s3630_s0] sm:$0xff]   ;;  %v2844_v17 = vld [vmem:[%s3630_s0 + $0x8] sm:$0xff]  }
  0x20   :  { %v2843_v15 = vld [vmem:[%s3631_s2] sm:$0xff]   ;;  %2594 = vmatpush3.bf16.msra.mxu0 %v2842_v14  ;;  %v2845_v18 = vld [vmem:[%s3631_s2 + $0x8] sm:$0xff]  }
  0x21   :  { %2602 = vmatpush3.bf16.msra.mxu1 %v2843_v15  ;;  %2595 = vmatprep.subr.bf16.mxu0 %v2966_v16  ;;  %v2384_v27 = vld [vmem:[%s3632_s7] ss:$0 sm:$0xff]  ;;  %v2847_v37 = vld [vmem:[%s3634_s30 + $0x8] sm:$0xff]  }
  0x22   :  { %2603 = vmatprep.subr.bf16.mxu1 %v2966_v16  ;;  %v2385_v31 = vld [vmem:[%s3633_s4] ss:$0 sm:$0xff]  ;;  %s3615_s4 = smov 16  }
  0x23   :  { %v2846_v35 = vld [vmem:[%s3634_s30] sm:$0xff]  }
  0x24   :  { %2596 = vmatpush3.bf16.msra.mxu0 %v2844_v17  ;;  %v2390_v38 = vld [vmem:[%s3635_s27] ss:$0 sm:$0xff] }
  0x25   :  { %2604 = vmatpush3.bf16.msra.mxu1 %v2845_v18  ;;  %2609 = vmatprep.subr.bf16.mxu0 %v2966_v16  ;;  %v2386_v39 = vld [vmem:[%s3636_s28] ss:$0 sm:$0xff] }
  0x26   :  { %2617 = vmatprep.subr.bf16.mxu1 %v2966_v16  ;;  %v2394_v58 = vld [vmem:[%s3637_s9] ss:$0 sm:$0xff] }
  0xa1   :  { %v92_v4 = vpop.xlane.xlu0 %91 }
  0xa2   :  { %v97_v5 = vmul.f32 0.03125, %v92_v4 }
  0xa4   :  { %v99_v6 = vsub.f32 %v85_v0, %v97_v5 }
  0xa5   :  { %v95_v7 = vpop.xlane.xlu0 %94 }
  0xa6   :  { %v98_v8 = vmul.f32 0.03125, %v95_v7  ;;  %v101_v9 = vmul.f32 %v99_v6, %v99_v6 }
  0xa8   :  { %v100_v10 = vsub.f32 %v86_v1, %v98_v8  ;;  %v103_v11 = vsel %vm89_vm0, %v101_v9, 0.0 }
  0xa9   :  { %104 = vadd.xlane.f32.xlu1 %v103_v11 }
  0xaa   :  { %v102_v12 = vmul.f32 %v100_v10, %v100_v10 }
  0xac   :  { %v106_v13 = vsel %vm89_vm0, %v102_v12, 0.0 }
  0xad   :  { %107 = vadd.xlane.f32.xlu1 %v106_v13 }
 0x136   :  { %v105_v19 = vpop.xlane.xlu1 %104 }
 0x137   :  { %v109_v20 = vmul.f32 0.03125, %v105_v19 }
 0x139   :  { %v111_v21 = vadd.f32 1e-12, %v109_v20 }
 0x13a   :  { %v108_v22 = vpop.xlane.xlu1 %107 }
 0x13b   :  { %2876 = vrsqrt.f32 %v111_v21  ;;  %v110_v23 = vmul.f32 0.03125, %v108_v22 }
 0x13d   :  { %v112_v24 = vadd.f32 1e-12, %v110_v23 }
 0x13f   :  { %2878 = vrsqrt.f32 %v112_v24 }
 0x145   :  { %v2877_v25 = vpop.eup %2876 }
 0x146   :  { %v115_v26 = vmul.f32 %v2877_v25, %v99_v6  ;;  %v3210_v25 = vld [vmem:[%s3638_s6 + $0x8] sm:$0xff] }
 0x148   :  { %v123_v30 = vmul.f32 %v2384_v27, %v115_v26 }
 0x149   :  { %v2879_v28 = vpop.eup %2878 }
 0x14a   :  { %v116_v29 = vmul.f32 %v2879_v28, %v100_v10  ;;  %v3144_v33 = vadd.f32 %v2385_v31, %v123_v30 }
 0x14c   :  { %v124_v32 = vmul.f32 %v2384_v27, %v116_v29 }
 0x14e   :  { %v3146_v34 = vadd.f32 %v2385_v31, %v124_v32 }
 0x150   :  { %v137_v36 = vpack.c.bf16 %v3146_v34, %v3144_v33 }
 0x152   :  { %2598 = vmatmul.mubr.msk.bf16.vlgmr.msra.gmra.mrb[0].mxu0 %vm89_vm0, %v137_v36  ;;  %2606 = vmatmul.mubr.msk.bf16.vlgmr.msra.gmra.mrb[0].mxu1 %vm89_vm0, %v137_v36 }
 0x153   :  { %2610 = vmatpush3.bf16.msra.mxu0 %v2846_v35  ;;  %2613 = vmatprep.mubr.msk.bf16.mxu0 %vm2967_vm1, %v2966_v16  ;;  %v3217_v35 = vld [vmem:[%s3638_s6 + $0x18] sm:$0xff] }
 0x154   :  { %2611 = vmatprep.subr.bf16.mxu0 %v2966_v16  ;;  %2619 = vmatprep.mubr.msk.bf16.mxu1 %vm2967_vm1, %v2966_v16 }
 0x157   :  { %2612 = vmatpush3.bf16.msra.mxu0 %v2847_v37 }
 0x158   :  { %2623 = vmatprep.subr.bf16.mxu0 %v2966_v16 }
 0x15a   :  { %2614 = vmatmul.mubr.msk.bf16.vlgmr.msra.gmra.mrb[4].mxu0 %vm89_vm0, %v137_v36 }
 0x15b   :  { %2625 = vmatprep.mubr.msk.bf16.mxu0 %vm2967_vm1, %v2966_v16 }
 0x225   :  { %v198_v40 = vpop.f32.mrb[0].mxu0  ;;  %v262_v41 = vpop.f32.mrb[0].mxu1 }
 0x226   :  { %v263_v42 = vadd.f32 %v2390_v38, %v262_v41  ;;  %v2599_v43 = vpop.f32.mrb[1].mxu0  ;;  %v2607_v44 = vpop.f32.mrb[1].mxu1  ;;  %v199_v47 = vadd.f32 %v2386_v39, %v198_v40  ;;  %v3222_v40 = vld [vmem:[%s3638_s6] sm:$0xff] }
 0x227   :  { %v201_v45 = vpop.f32.mrb[2].mxu0  ;;  %v265_v46 = vpop.f32.mrb[2].mxu1 }
 0x228   :  { %v353_v48 = vpack.c.bf16 %v263_v42, %v263_v42  ;;  %v266_v49 = vadd.f32 %v2390_v38, %v265_v46  ;;  %346 = vrot.lane.b32.xlu0 %v263_v42, %s3616_s8  ;;  %v2600_v50 = vpop.f32.mrb[3].mxu0  ;;  %v2608_v51 = vpop.f32.mrb[3].mxu1  ;;  %v202_v55 = vadd.f32 %v2386_v39, %v201_v45  ;;  %v341_v60 = vpack.c.bf16 %v199_v47, %v199_v47  ;;  %v3230_v46 = vld [vmem:[%s3638_s6 + $0x10] sm:$0xff]  ;;  %s3641_s6 = smov 16  }
 0x22a   :  { %v2822_v52 = vpack.i.bf16 %v266_v49, %v199_v47  ;;  %v374_v53 = vsel %vm369_vm2, %v353_v48, 0  ;;  %v355_v56 = vpack.c.bf16 %v266_v49, %v266_v49  ;;  %v343_v2 = vpack.c.bf16 %v202_v55, %v202_v55 }
 0x22b   :  { %2618 = vmatpush3.bf16.xpose.msra.mxu1 %v374_v53 }
 0x22c   :  { %2823 = vrot.lane.b32.xlu1 %v2822_v52, %s3616_s8  ;;  %2629 = vmatprep.subr.bf16.mxu1 %v2966_v16  ;;  %v466_v0 = vsel %vm369_vm2, %v355_v56, 0 }
 0x22d   :  { %v326_v54 = vpop.f32.mrb[4].mxu0 }
 0x22e   :  { %v2615_v57 = vpop.f32.mrb[5].mxu0  ;;  %v3183_v63 = vadd.f32 %v2394_v58, %v326_v54 }
 0x22f   :  { %v329_v59 = vpop.f32.mrb[6].mxu0 }
 0x230   :  { %v3180_v61 = vadd.f32 %v2394_v58, %v329_v59  ;;  %338 = vrot.lane.b32.xlu1 %v202_v55, %s3616_s8  ;;  %v2616_v62 = vpop.f32.mrb[7].mxu0  ;;  %v365_v1 = vpack.c.bf16 %v3183_v63, %v3183_v63 }
 0x232   :  { %2620 = vmatmul.mubr.msk.bf16.vlgmr.msra.gmra.mrb[4].mxu1 %vm369_vm2, %v341_v60  ;;  %v616_v3 = vsel %vm614_vm3, %v365_v1, 0 }
 0x233   :  { %2630 = vmatpush3.bf16.xpose.msra.mxu1 %v466_v0  ;;  %2631 = vmatprep.mubr.msk.bf16.mxu1 %vm2967_vm1, %v2966_v16 }
 0x234   :  { %2641 = vmatprep.subr.bf16.mxu1 %v2966_v16 }
 0x23a   :  { %2632 = vmatmul.mubr.msk.bf16.vlgmr.msra.gmra.mrb[8].mxu1 %vm369_vm2, %v343_v2 }
 0x23b   :  { %2642 = vmatpush3.bf16.msra.mxu1 %v616_v3  ;;  %2643 = vmatprep.mubr.msk.bf16.mxu1 %vm2967_vm1, %v2966_v16 }
 0x23c   :  { %2653 = vmatprep.subr.bf16.mxu1 %v2966_v16 }
 0x29a   :  { %v347_v4 = vpop.permute.xlu0 %346 }
 0x29b   :  { %v354_v5 = vpack.c.bf16 %v347_v4, %v347_v4 }
 0x29d   :  { %v420_v6 = vsel %vm369_vm2, %v354_v5, 0 }
 0x29e   :  { %2624 = vmatpush3.bf16.xpose.msra.mxu0 %v420_v6  ;;  %v2824_v7 = vpop.permute.xlu1 %2823 }
 0x29f   :  { %v2826_v8 = vunpack.i.h.bf16 %v2824_v7  ;;  %v2825_v9 = vunpack.i.l.bf16 %v2824_v7  ;;  %2635 = vmatprep.subr.bf16.mxu0 %v2966_v16 }
 0x2a1   :  { %v356_v10 = vpack.c.bf16 %v2826_v8, %v2826_v8  ;;  %v342_v11 = vpack.c.bf16 %v2825_v9, %v2825_v9 }
 0x2a2   :  { %v339_v13 = vpop.permute.xlu1 %338 }
 0x2a3   :  { %v512_v12 = vsel %vm369_vm2, %v356_v10, 0  ;;  %v344_v14 = vpack.c.bf16 %v339_v13, %v339_v13 }
 0x2a5   :  { %2626 = vmatmul.mubr.msk.bf16.vlgmr.msra.gmra.mrb[8].mxu0 %vm369_vm2, %v342_v11 }
 0x2a6   :  { %2636 = vmatpush3.bf16.xpose.msra.mxu0 %v512_v12  ;;  %2637 = vmatprep.mubr.msk.bf16.mxu0 %vm2967_vm1, %v2966_v16 }
 0x2a7   :  { %2647 = vmatprep.subr.bf16.mxu0 %v2966_v16 }
 0x2ad   :  { %2638 = vmatmul.mubr.msk.bf16.vlgmr.msra.gmra.mrb[12].mxu0 %vm369_vm2, %v344_v14 }
 0x2ae   :  { %2649 = vmatprep.mubr.msk.bf16.mxu0 %vm2967_vm1, %v2966_v16 }
 0x305   :  { %v410_v15 = vpop.f32.mrb[4].mxu1 }
 0x306   :  { %v2621_v17 = vpop.f32.mrb[5].mxu1  ;;  %v554_v36 = vmul.f32 0.25, %v410_v15 }
 0x307   :  { %v413_v18 = vpop.f32.mrb[6].mxu1 }
 0x308   :  { %v2622_v19 = vpop.f32.mrb[7].mxu1  ;;  %v558_v45 = vadd.f32 %v554_v36, %v3222_v40  ;;  %v2849_v36 = vld [vmem:[%s3639_s1 + $0x8] sm:$0xff]  }
 0x30a   :  { %v563_v47 = vsel %vm562_vm4, %v558_v45, -inf }
 0x30d   :  { %v502_v20 = vpop.f32.mrb[8].mxu1 }
 0x30e   :  { %v2633_v21 = vpop.f32.mrb[9].mxu1  ;;  %v556_v43 = vmul.f32 0.25, %v502_v20 }
 0x30f   :  { %v505_v22 = vpop.f32.mrb[10].mxu1 }
 0x310   :  { %v2634_v23 = vpop.f32.mrb[11].mxu1  ;;  %v560_v48 = vadd.f32 %v556_v43, %v3230_v46 }
 0x312   :  { %v569_v49 = vsel %vm562_vm4, %v560_v48, -inf }
 0x378   :  { %v456_v24 = vpop.f32.mrb[8].mxu0 }
 0x379   :  { %v555_v26 = vmul.f32 0.25, %v456_v24  ;;  %v2627_v27 = vpop.f32.mrb[9].mxu0 }
 0x37a   :  { %v459_v28 = vpop.f32.mrb[10].mxu0 }
 0x37b   :  { %v2628_v29 = vpop.f32.mrb[11].mxu0  ;;  %v559_v30 = vadd.f32 %v555_v26, %v3210_v25  ;;  %v367_v26 = vpack.c.bf16 %v3180_v61, %v3180_v61 }
 0x37d   :  { %v566_v31 = vsel %vm562_vm4, %v559_v30, -inf  ;;  %v708_v29 = vsel %vm614_vm3, %v367_v26, 0 }
 0x37e   :  { %567 = vmax.xlane.f32.xlu1 %v566_v31 }
 0x380   :  { %v548_v32 = vpop.f32.mrb[12].mxu0 }
 0x381   :  { %v557_v37 = vmul.f32 0.25, %v548_v32  ;;  %v2639_v38 = vpop.f32.mrb[13].mxu0 }
 0x382   :  { %v551_v39 = vpop.f32.mrb[14].mxu0 }
 0x383   :  { %v2640_v41 = vpop.f32.mrb[15].mxu0  ;;  %v561_v42 = vadd.f32 %v557_v37, %v3217_v35 }
 0x385   :  { %v572_v44 = vsel %vm562_vm4, %v561_v42, -inf }
 0x386   :  { %573 = vmax.xlane.f32.xlu0 %v572_v44 }
 0x38a   :  { %564 = vmax.xlane.f32.xlu0 %v563_v47 }
 0x38e   :  { %570 = vmax.xlane.f32.xlu0 %v569_v49 }
 0x40b   :  { %v568_v50 = vpop.xlane.xlu1 %567 }
 0x40c   :  { %v576_v51 = vsub.f32 %v559_v30, %v568_v50 }
 0x40e   :  { %v581_v52 = vmul.f32 1.442695, %v576_v51 }
 0x410   :  { %2880 = vpow2.f32 %v581_v52 }
 0x413   :  { %v574_v53 = vpop.xlane.xlu0 %573 }
 0x414   :  { %v578_v54 = vsub.f32 %v561_v42, %v574_v53 }
 0x416   :  { %v585_v55 = vmul.f32 1.442695, %v578_v54 }
 0x417   :  { %v565_v60 = vpop.xlane.xlu0 %564 }
 0x418   :  { %2882 = vpow2.f32 %v585_v55  ;;  %v575_v62 = vsub.f32 %v558_v45, %v565_v60 }
 0x41a   :  { %v2881_v56 = vpop.eup %2880  ;;  %v579_v0 = vmul.f32 1.442695, %v575_v62 }
 0x41b   :  { %v590_v57 = vsel %vm562_vm4, %v2881_v56, 0.0  ;;  %v571_v1 = vpop.xlane.xlu0 %570 }
 0x41c   :  { %591 = vadd.xlane.f32.xlu1 %v590_v57  ;;  %2884 = vpow2.f32 %v579_v0  ;;  %v577_v2 = vsub.f32 %v560_v48, %v571_v1  ;;  %v2406_v0 = vld [vmem:[%s3590_s11] ss:$0 sm:$0xff] }
 0x41e   :  { %v583_v3 = vmul.f32 1.442695, %v577_v2 }
 0x420   :  { %2886 = vpow2.f32 %v583_v3 }
 0x422   :  { %v2883_v58 = vpop.eup %2882 }
 0x423   :  { %v596_v59 = vsel %vm562_vm4, %v2883_v58, 0.0 }
 0x424   :  { %597 = vadd.xlane.f32.xlu0 %v596_v59 }
 0x426   :  { %v2885_v4 = vpop.eup %2884 }
 0x427   :  { %v587_v5 = vsel %vm562_vm4, %v2885_v4, 0.0 }
 0x42a   :  { %v2887_v6 = vpop.eup %2886 }
 0x42b   :  { %v593_v7 = vsel %vm562_vm4, %v2887_v6, 0.0 }
 0x42d   :  { %358 = vrot.lane.b32.xlu1 %v3183_v63, %s3616_s8 }
 0x43a   :  { %362 = vrot.lane.b32.xlu0 %v3180_v61, %s3616_s8  ;;  %v2848_v61 = vld [vmem:[%s3639_s1] sm:$0xff]  }
 0x451   :  { %588 = vadd.xlane.f32.xlu1 %v587_v5 }
 0x459   :  { %594 = vadd.xlane.f32.xlu0 %v593_v7 }
 0x4a9   :  { %v592_v63 = vpop.xlane.xlu1 %591 }
 0x4aa   :  { %2888 = vrcp.f32 %v592_v63 }
 0x4ad   :  { %v359_v8 = vpop.permute.xlu1 %358 }
 0x4ae   :  { %v366_v9 = vpack.c.bf16 %v359_v8, %v359_v8 }
 0x4b0   :  { %v662_v10 = vsel %vm614_vm3, %v366_v9, 0 }
 0x4b1   :  { %2648 = vmatpush3.bf16.msra.mxu0 %v662_v10  ;;  %v598_v11 = vpop.xlane.xlu0 %597 }
 0x4b2   :  { %2890 = vrcp.f32 %v598_v11  ;;  %2659 = vmatprep.subr.bf16.mxu0 %v2966_v16 }
 0x4b4   :  { %v2889_v12 = vpop.eup %2888 }
 0x4b5   :  { %v604_v13 = vmul.f32 %v2889_v12, %v2881_v56  ;;  %v363_v14 = vpop.permute.xlu0 %362 }
 0x4b6   :  { %v368_v15 = vpack.c.bf16 %v363_v14, %v363_v14 }
 0x4b7   :  { %v608_v17 = vpack.c.bf16 %v604_v13, %v604_v13 }
 0x4b8   :  { %v754_v18 = vsel %vm614_vm3, %v368_v15, 0 }
 0x4b9   :  { %2650 = vmatmul.mubr.msk.bf16.vlgmr.msra.gmra.mrb[16].mxu0 %vm562_vm4, %v608_v17 }
 0x4ba   :  { %2660 = vmatpush3.bf16.msra.mxu0 %v754_v18  ;;  %2661 = vmatprep.mubr.msk.bf16.mxu0 %vm2967_vm1, %v2966_v16 }
 0x4bb   :  { %2673 = vmatprep.subr.bf16.mxu0 %v2966_v16 }
 0x4bc   :  { %v2891_v19 = vpop.eup %2890 }
 0x4bd   :  { %v606_v20 = vmul.f32 %v2891_v19, %v2883_v58 }
 0x4bf   :  { %v610_v21 = vpack.c.bf16 %v606_v20, %v606_v20  ;;  %v2851_v20 = vld [vmem:[%s3593_s14 + $0x8] sm:$0xff]  }
 0x4c1   :  { %2662 = vmatmul.mubr.msk.bf16.vlgmr.msra.gmra.mrb[20].mxu0 %vm562_vm4, %v610_v21 }
 0x4c2   :  { %2677 = vmatprep.mubr.msk.bf16.mxu0 %vm2967_vm1, %v2966_v16 }
 0x4de   :  { %v589_v22 = vpop.xlane.xlu1 %588 }
 0x4df   :  { %2892 = vrcp.f32 %v589_v22 }
 0x4e6   :  { %v595_v23 = vpop.xlane.xlu0 %594 }
 0x4e7   :  { %2894 = vrcp.f32 %v595_v23 }
 0x4e9   :  { %v2893_v24 = vpop.eup %2892 }
 0x4ea   :  { %v603_v27 = vmul.f32 %v2893_v24, %v2885_v4 }
 0x4ec   :  { %v607_v28 = vpack.c.bf16 %v603_v27, %v603_v27 }
 0x4ee   :  { %2644 = vmatmul.mubr.msk.bf16.vlgmr.msra.gmra.mrb[12].mxu1 %vm562_vm4, %v607_v28 }
 0x4ef   :  { %2654 = vmatpush3.bf16.msra.mxu1 %v708_v29  ;;  %2655 = vmatprep.mubr.msk.bf16.mxu1 %vm2967_vm1, %v2966_v16 }
 0x4f0   :  { %2665 = vmatprep.subr.bf16.mxu1 %v2966_v16 }
 0x4f1   :  { %v2895_v30 = vpop.eup %2894 }
 0x4f2   :  { %v605_v31 = vmul.f32 %v2895_v30, %v2887_v6  ;;  %v2410_v30 = vld [vmem:[%s3591_s12] ss:$0 sm:$0xff] }
 0x4f4   :  { %v609_v32 = vpack.c.bf16 %v605_v31, %v605_v31 }
 0x4f6   :  { %2656 = vmatmul.mubr.msk.bf16.vlgmr.msra.gmra.mrb[16].mxu1 %vm562_vm4, %v609_v32 }
 0x4f7   :  { %2669 = vmatprep.mubr.msk.bf16.mxu1 %vm2967_vm1, %v2966_v16  ;;  %2666 = vmatpush3.bf16.msra.mxu1 %v2848_v61 }
 0x4f8   :  { %2667 = vmatprep.subr.bf16.mxu1 %v2966_v16 }
 0x4fb   :  { %2668 = vmatpush3.bf16.msra.mxu1 %v2849_v36  ;;  %v2411_v36 = vld [vmem:[%s3592_s13] ss:$0 sm:$0xff] }
 0x4fc   :  { %2681 = vmatprep.subr.bf16.mxu1 %v2966_v16 }
 0x58c   :  { %v698_v37 = vpop.f32.mrb[16].mxu0 }
 0x58d   :  { %v2651_v38 = vpop.f32.mrb[17].mxu0 }
 0x58e   :  { %v701_v39 = vpop.f32.mrb[18].mxu0 }
 0x58f   :  { %v2652_v41 = vpop.f32.mrb[19].mxu0 }
 0x594   :  { %v790_v42 = vpop.f32.mrb[20].mxu0 }
 0x595   :  { %v2827_v43 = vpack.i.bf16 %v790_v42, %v698_v37  ;;  %v2663_v44 = vpop.f32.mrb[21].mxu0  ;;  %v2852_v42 = vld [vmem:[%s3595_s16] sm:$0xff]  }
 0x596   :  { %v793_v45 = vpop.f32.mrb[22].mxu0  ;;  %v2854_v44 = vld [vmem:[%s3595_s16 + $0x10] sm:$0xff]  }
 0x597   :  { %2828 = vrot.lane.b32.xlu1 %v2827_v43, %s3615_s4  ;;  %v2664_v47 = vpop.f32.mrb[23].mxu0  ;;  %v2853_v43 = vld [vmem:[%s3595_s16 + $0x8] sm:$0xff]   ;;  %v2855_v45 = vld [vmem:[%s3595_s16 + $0x18] sm:$0xff]  }
 0x598   :  { %v2412_v47 = vld [vmem:[%s3594_s15] ss:$0 sm:$0xff] }
 0x5c1   :  { %v652_v48 = vpop.f32.mrb[12].mxu1 }
 0x5c2   :  { %v2645_v49 = vpop.f32.mrb[13].mxu1 }
 0x5c3   :  { %v655_v50 = vpop.f32.mrb[14].mxu1 }
 0x5c4   :  { %v2646_v51 = vpop.f32.mrb[15].mxu1 }
 0x5c9   :  { %v744_v52 = vpop.f32.mrb[16].mxu1 }
 0x5ca   :  { %v2657_v53 = vpop.f32.mrb[17].mxu1 }
 0x5cb   :  { %v747_v54 = vpop.f32.mrb[18].mxu1 }
 0x5cc   :  { %v2658_v55 = vpop.f32.mrb[19].mxu1 }
 0x609   :  { %v2829_v56 = vpop.permute.xlu1 %2828 }
 0x60a   :  { %v2831_v57 = vunpack.i.h.bf16 %v2829_v56  ;;  %v2830_v58 = vunpack.i.l.bf16 %v2829_v56 }
 0x60c   :  { %v805_v59 = vsel %vm369_vm2, %v744_v52, %v2831_v57  ;;  %v800_v60 = vsel %vm369_vm2, %v652_v48, %v2830_v58 }
 0x60d   :  { %v806_v62 = vpack.c.bf16 %v805_v59, %v800_v60 }
 0x60f   :  { %2670 = vmatmul.mubr.msk.bf16.vlgmr.msra.gmra.mrb[20].mxu1 %vm89_vm0, %v806_v62 }
 0x610   :  { %2689 = vmatprep.mubr.msk.bf16.mxu1 %vm2967_vm1, %v2966_v16  ;;  %2682 = vmatpush3.bf16.msra.mxu1 %v2852_v42 }
 0x611   :  { %2683 = vmatprep.subr.bf16.mxu1 %v2966_v16 }
 0x614   :  { %2684 = vmatpush3.bf16.msra.mxu1 %v2853_v43 }
 0x615   :  { %2685 = vmatprep.subr.bf16.mxu1 %v2966_v16 }
 0x618   :  { %2686 = vmatpush3.bf16.msra.mxu1 %v2854_v44 }
 0x619   :  { %2687 = vmatprep.subr.bf16.mxu1 %v2966_v16 }
 0x61c   :  { %2688 = vmatpush3.bf16.msra.mxu1 %v2855_v45 }
 0x61d   :  { %2709 = vmatprep.subr.bf16.mxu1 %v2966_v16 }
 0x6e2   :  { %v867_v1 = vpop.f32.mrb[20].mxu1 }
 0x6e3   :  { %v868_v2 = vadd.f32 %v2406_v0, %v867_v1  ;;  %v2671_v3 = vpop.f32.mrb[21].mxu1 }
 0x6e4   :  { %v870_v4 = vpop.f32.mrb[22].mxu1 }
 0x6e5   :  { %v871_v5 = vadd.f32 %v2406_v0, %v870_v4  ;;  %v2672_v6 = vpop.f32.mrb[23].mxu1  ;;  %v874_v7 = vadd.f32 %v868_v2, %v3144_v33 }
 0x6e7   :  { %v878_v63 = vsel %vm89_vm0, %v874_v7, 0.0  ;;  %v875_v8 = vadd.f32 %v871_v5, %v3146_v34  ;;  %v2850_v34 = vld [vmem:[%s3593_s14] sm:$0xff]  }
 0x6e8   :  { %879 = vadd.xlane.f32.xlu0 %v878_v63  ;;  %2674 = vmatpush3.bf16.msra.mxu0 %v2850_v34 }
 0x6e9   :  { %v881_v9 = vsel %vm89_vm0, %v875_v8, 0.0  ;;  %2675 = vmatprep.subr.bf16.mxu0 %v2966_v16 }
 0x6ec   :  { %882 = vadd.xlane.f32.xlu0 %v881_v9  ;;  %2676 = vmatpush3.bf16.msra.mxu0 %v2851_v20 }
 0x6ed   :  { %2693 = vmatprep.subr.bf16.mxu0 %v2966_v16 }
 0x775   :  { %v880_v10 = vpop.xlane.xlu0 %879 }
 0x776   :  { %v884_v11 = vmul.f32 0.03125, %v880_v10  ;;  %v2416_v10 = vld [vmem:[%s3596_s17] ss:$0 sm:$0xff] }
 0x778   :  { %v886_v12 = vsub.f32 %v874_v7, %v884_v11 }
 0x779   :  { %v883_v13 = vpop.xlane.xlu0 %882 }
 0x77a   :  { %v885_v14 = vmul.f32 0.03125, %v883_v13  ;;  %v888_v15 = vmul.f32 %v886_v12, %v886_v12 }
 0x77c   :  { %v887_v17 = vsub.f32 %v875_v8, %v885_v14  ;;  %v890_v18 = vsel %vm89_vm0, %v888_v15, 0.0 }
 0x77d   :  { %891 = vadd.xlane.f32.xlu0 %v890_v18 }
 0x77e   :  { %v889_v19 = vmul.f32 %v887_v17, %v887_v17 }
 0x780   :  { %v893_v33 = vsel %vm89_vm0, %v889_v19, 0.0 }
 0x781   :  { %894 = vadd.xlane.f32.xlu0 %v893_v33 }
 0x80a   :  { %v892_v21 = vpop.xlane.xlu0 %891 }
 0x80b   :  { %v896_v22 = vmul.f32 0.03125, %v892_v21 }
 0x80d   :  { %v898_v23 = vadd.f32 1e-12, %v896_v22 }
 0x80e   :  { %v895_v24 = vpop.xlane.xlu0 %894 }
 0x80f   :  { %2896 = vrsqrt.f32 %v898_v23  ;;  %v897_v26 = vmul.f32 0.03125, %v895_v24 }
 0x811   :  { %v899_v27 = vadd.f32 1e-12, %v897_v26 }
 0x813   :  { %2898 = vrsqrt.f32 %v899_v27 }
 0x819   :  { %v2897_v28 = vpop.eup %2896 }
 0x81a   :  { %v902_v29 = vmul.f32 %v2897_v28, %v886_v12 }
 0x81c   :  { %v910_v32 = vmul.f32 %v2410_v30, %v902_v29 }
 0x81d   :  { %v2899_v31 = vpop.eup %2898 }
 0x81e   :  { %v903_v61 = vmul.f32 %v2899_v31, %v887_v17  ;;  %v918_v38 = vadd.f32 %v2411_v36, %v910_v32  ;;  %v2856_v31 = vld [vmem:[%s3630_s0 + $0x10] sm:$0xff]  }
 0x81f   :  { %v2857_v32 = vld [vmem:[%s3634_s30 + $0x10] sm:$0xff]  }
 0x820   :  { %v911_v37 = vmul.f32 %v2410_v30, %v903_v61  ;;  %v2858_v61 = vld [vmem:[%s3630_s0 + $0x18] sm:$0xff]  }
 0x822   :  { %v919_v39 = vadd.f32 %v2411_v36, %v911_v37  ;;  %v2859_v36 = vld [vmem:[%s3634_s30 + $0x18] sm:$0xff]  }
 0x824   :  { %v920_v41 = vpack.c.bf16 %v919_v39, %v918_v38 }
 0x826   :  { %2678 = vmatmul.mubr.msk.bf16.vlgmr.msra.gmra.mrb[24].mxu0 %vm89_vm0, %v920_v41 }
 0x827   :  { %2697 = vmatprep.mubr.msk.bf16.mxu0 %vm2967_vm1, %v2966_v16  ;;  %2694 = vmatpush3.bf16.msra.mxu0 %v2856_v31 }
 0x828   :  { %2695 = vmatprep.subr.bf16.mxu0 %v2966_v16 }
 0x82b   :  { %2696 = vmatpush3.bf16.msra.mxu0 %v2858_v61 }
 0x82c   :  { %2701 = vmatprep.subr.bf16.mxu0 %v2966_v16 }
 0x8f9   :  { %v981_v48 = vpop.f32.mrb[24].mxu0 }
 0x8fa   :  { %v982_v49 = vadd.f32 %v2412_v47, %v981_v48  ;;  %v2679_v50 = vpop.f32.mrb[25].mxu0 }
 0x8fb   :  { %v984_v51 = vpop.f32.mrb[26].mxu0 }
 0x8fc   :  { %v990_v52 = vmul.f32 0.044715, %v982_v49  ;;  %v985_v53 = vadd.f32 %v2412_v47, %v984_v51  ;;  %v2680_v54 = vpop.f32.mrb[27].mxu0  ;;  %v988_v5 = vmul.f32 0.5, %v982_v49  ;;  %v2422_v47 = vld [vmem:[%s3597_s18] ss:$0 sm:$0xff] }
 0x8fd   :  { %v2423_v51 = vld [vmem:[%s3598_s19] ss:$0 sm:$0xff] }
 0x8fe   :  { %v992_v55 = vmul.f32 %v990_v52, %v982_v49  ;;  %v991_v56 = vmul.f32 0.044715, %v985_v53  ;;  %v989_v6 = vmul.f32 0.5, %v985_v53 }
 0x900   :  { %v994_v57 = vmul.f32 %v992_v55, %v982_v49  ;;  %v993_v58 = vmul.f32 %v991_v56, %v985_v53  ;;  %v2860_v55 = vld [vmem:[%s3631_s2 + $0x10] sm:$0xff]  }
 0x902   :  { %v996_v59 = vadd.f32 %v994_v57, %v982_v49  ;;  %v995_v60 = vmul.f32 %v993_v58, %v985_v53  ;;  %v2861_v57 = vld [vmem:[%s3631_s2 + $0x18] sm:$0xff]  }
 0x904   :  { %v998_v62 = vmul.f32 0.7978846, %v996_v59  ;;  %v997_v0 = vadd.f32 %v995_v60, %v985_v53 }
 0x906   :  { %2900 = vtanh.f32 %v998_v62  ;;  %v999_v1 = vmul.f32 0.7978846, %v997_v0  ;;  %v2447_v0 = vld [vmem:[%s3637_s9 + $0x1] ss:$0 sm:$0xff]  ;;  %s3640_s9 = smov 112  }
 0x908   :  { %2902 = vtanh.f32 %v999_v1 }
 0x910   :  { %v2901_v2 = vpop.eup %2900 }
 0x911   :  { %v1002_v3 = vadd.f32 1.0, %v2901_v2 }
 0x912   :  { %v2903_v4 = vpop.eup %2902 }
 0x913   :  { %v1003_v7 = vadd.f32 1.0, %v2903_v4  ;;  %v1004_v63 = vmul.f32 %v1002_v3, %v988_v5 }
 0x915   :  { %v1005_v8 = vmul.f32 %v1003_v7, %v989_v6  ;;  %v2438_v6 = vld [vmem:[%s3635_s27 + $0x1] ss:$0 sm:$0xff] }
 0x916   :  { %v2429_v7 = vld [vmem:[%s3636_s28 + $0x1] ss:$0 sm:$0xff] }
 0x917   :  { %v1006_v9 = vpack.c.bf16 %v1005_v8, %v1004_v63 }
 0x919   :  { %2690 = vmatmul.mubr.msk.bf16.vlgmr.msra.gmra.mrb[24].mxu1 %vm1046_vm5, %v1006_v9 }
 0x91a   :  { %2713 = vmatprep.mubr.msk.bf16.mxu1 %vm2967_vm1, %v2966_v16  ;;  %2710 = vmatpush3.bf16.msra.mxu1 %v2857_v32 }
 0x91b   :  { %2711 = vmatprep.subr.bf16.mxu1 %v2966_v16 }
 0x91e   :  { %2712 = vmatpush3.bf16.msra.mxu1 %v2859_v36 }
 0x91f   :  { %2723 = vmatprep.subr.bf16.mxu1 %v2966_v16 }
 0x9ec   :  { %v1084_v11 = vpop.f32.mrb[24].mxu1 }
 0x9ed   :  { %v1085_v12 = vadd.f32 %v2416_v10, %v1084_v11  ;;  %v2691_v13 = vpop.f32.mrb[25].mxu1 }
 0x9ee   :  { %v1087_v14 = vpop.f32.mrb[26].mxu1 }
 0x9ef   :  { %v1088_v15 = vadd.f32 %v2416_v10, %v1087_v14  ;;  %v2692_v17 = vpop.f32.mrb[27].mxu1  ;;  %v1091_v18 = vadd.f32 %v1085_v12, %v918_v38 }
 0x9f1   :  { %v1095_v19 = vsel %vm89_vm0, %v1091_v18, 0.0  ;;  %v1092_v33 = vadd.f32 %v1088_v15, %v919_v39 }
 0x9f2   :  { %1096 = vadd.xlane.f32.xlu1 %v1095_v19 }
 0x9f3   :  { %v1098_v34 = vsel %vm89_vm0, %v1092_v33, 0.0 }
 0x9f4   :  { %1099 = vadd.xlane.f32.xlu0 %v1098_v34 }
 0xa7f   :  { %v1097_v20 = vpop.xlane.xlu1 %1096 }
 0xa80   :  { %v1101_v21 = vmul.f32 0.03125, %v1097_v20 }
 0xa81   :  { %v1100_v22 = vpop.xlane.xlu0 %1099 }
 0xa82   :  { %v1103_v23 = vsub.f32 %v1091_v18, %v1101_v21  ;;  %v1102_v24 = vmul.f32 0.03125, %v1100_v22 }
 0xa84   :  { %v1104_v26 = vsub.f32 %v1092_v33, %v1102_v24  ;;  %v1105_v27 = vmul.f32 %v1103_v23, %v1103_v23 }
 0xa86   :  { %v1107_v28 = vsel %vm89_vm0, %v1105_v27, 0.0  ;;  %v1106_v29 = vmul.f32 %v1104_v26, %v1104_v26 }
 0xa87   :  { %1108 = vadd.xlane.f32.xlu0 %v1107_v28 }
 0xa88   :  { %v1110_v30 = vsel %vm89_vm0, %v1106_v29, 0.0 }
 0xa8b   :  { %1111 = vadd.xlane.f32.xlu0 %v1110_v30 }
 0xb14   :  { %v1109_v37 = vpop.xlane.xlu0 %1108 }
 0xb15   :  { %v1113_v38 = vmul.f32 0.03125, %v1109_v37 }
 0xb17   :  { %v1115_v39 = vadd.f32 1e-12, %v1113_v38 }
 0xb18   :  { %v1112_v41 = vpop.xlane.xlu0 %1111 }
 0xb19   :  { %2904 = vrsqrt.f32 %v1115_v39  ;;  %v1114_v42 = vmul.f32 0.03125, %v1112_v41 }
 0xb1b   :  { %v1116_v43 = vadd.f32 1e-12, %v1114_v42 }
 0xb1d   :  { %2906 = vrsqrt.f32 %v1116_v43 }
 0xb23   :  { %v2905_v44 = vpop.eup %2904 }
 0xb24   :  { %v1119_v45 = vmul.f32 %v2905_v44, %v1103_v23 }
 0xb26   :  { %v1127_v49 = vmul.f32 %v2422_v47, %v1119_v45 }
 0xb27   :  { %v2907_v48 = vpop.eup %2906 }
 0xb28   :  { %v1120_v50 = vmul.f32 %v2907_v48, %v1104_v26  ;;  %v3354_v53 = vadd.f32 %v2423_v51, %v1127_v49 }
 0xb2a   :  { %v1128_v52 = vmul.f32 %v2422_v47, %v1120_v50 }
 0xb2c   :  { %v3356_v54 = vadd.f32 %v2423_v51, %v1128_v52 }
 0xb2e   :  { %v1137_v56 = vpack.c.bf16 %v3356_v54, %v3354_v53 }
 0xb30   :  { %2698 = vmatmul.mubr.msk.bf16.vlgmr.msra.gmra.mrb[28].mxu0 %vm89_vm0, %v1137_v56  ;;  %2714 = vmatmul.mubr.msk.bf16.vlgmr.msra.gmra.mrb[28].mxu1 %vm89_vm0, %v1137_v56 }
 0xb31   :  { %2702 = vmatpush3.bf16.msra.mxu0 %v2860_v55  ;;  %2705 = vmatprep.mubr.msk.bf16.mxu0 %vm2967_vm1, %v2966_v16 }
 0xb32   :  { %2703 = vmatprep.subr.bf16.mxu0 %v2966_v16  ;;  %2725 = vmatprep.mubr.msk.bf16.mxu1 %vm2967_vm1, %v2966_v16 }
 0xb35   :  { %2704 = vmatpush3.bf16.msra.mxu0 %v2861_v57 }
 0xb36   :  { %2717 = vmatprep.subr.bf16.mxu0 %v2966_v16 }
 0xb38   :  { %2706 = vmatmul.mubr.msk.bf16.vlgmr.msra.gmra.mrb[32].mxu0 %vm89_vm0, %v1137_v56 }
 0xb39   :  { %2719 = vmatprep.mubr.msk.bf16.mxu0 %vm2967_vm1, %v2966_v16 }
 0xc03   :  { %v1200_v58 = vpop.f32.mrb[28].mxu0  ;;  %v1332_v59 = vpop.f32.mrb[28].mxu1 }
 0xc04   :  { %v2699_v60 = vpop.f32.mrb[29].mxu0  ;;  %v2715_v62 = vpop.f32.mrb[29].mxu1  ;;  %v1201_v11 = vadd.f32 %v2429_v7, %v1200_v58  ;;  %v3393_v34 = vadd.f32 %v2447_v0, %v1332_v59 }
 0xc05   :  { %v1203_v1 = vpop.f32.mrb[30].mxu0  ;;  %v1335_v2 = vpop.f32.mrb[30].mxu1 }
 0xc06   :  { %v3380_v3 = vadd.f32 %v2447_v0, %v1335_v2  ;;  %v2700_v4 = vpop.f32.mrb[31].mxu0  ;;  %v2716_v5 = vpop.f32.mrb[31].mxu1  ;;  %v1204_v15 = vadd.f32 %v2429_v7, %v1203_v1  ;;  %v1347_v33 = vpack.c.bf16 %v1201_v11, %v1201_v11  ;;  %v1371_v21 = vpack.c.bf16 %v3393_v34, %v3393_v34 }
 0xc08   :  { %v1349_v22 = vpack.c.bf16 %v1204_v15, %v1204_v15  ;;  %v1619_v23 = vsel %vm614_vm3, %v1371_v21, 0 }
 0xc0b   :  { %v1266_v63 = vpop.f32.mrb[32].mxu0 }
 0xc0c   :  { %v1267_v8 = vadd.f32 %v2438_v6, %v1266_v63  ;;  %v2707_v9 = vpop.f32.mrb[33].mxu0 }
 0xc0d   :  { %v1269_v10 = vpop.f32.mrb[34].mxu0 }
 0xc0e   :  { %v1359_v12 = vpack.c.bf16 %v1267_v8, %v1267_v8  ;;  %v1270_v13 = vadd.f32 %v2438_v6, %v1269_v10  ;;  %1352 = vrot.lane.b32.xlu0 %v1267_v8, %s3640_s9  ;;  %v2708_v14 = vpop.f32.mrb[35].mxu0 }
 0xc10   :  { %v2832_v17 = vpack.i.bf16 %v1270_v13, %v1201_v11  ;;  %v1379_v18 = vsel %vm369_vm2, %v1359_v12, 0  ;;  %v1361_v19 = vpack.c.bf16 %v1270_v13, %v1270_v13 }
 0xc11   :  { %2718 = vmatpush3.bf16.xpose.msra.mxu0 %v1379_v18 }
 0xc12   :  { %1344 = vrot.lane.b32.xlu0 %v1204_v15, %s3640_s9  ;;  %2833 = vrot.lane.b32.xlu1 %v2832_v17, %s3640_s9  ;;  %v1471_v20 = vsel %vm369_vm2, %v1361_v19, 0 }
 0xc13   :  { %2729 = vmatprep.subr.bf16.mxu0 %v2966_v16 }
 0xc18   :  { %2720 = vmatmul.mubr.msk.bf16.vlgmr.msra.gmra.mrb[36].mxu0 %vm369_vm2, %v1347_v33 }
 0xc19   :  { %2730 = vmatpush3.bf16.xpose.msra.mxu0 %v1471_v20  ;;  %2731 = vmatprep.mubr.msk.bf16.mxu0 %vm2967_vm1, %v2966_v16 }
 0xc1a   :  { %2741 = vmatprep.subr.bf16.mxu0 %v2966_v16 }
 0xc20   :  { %2732 = vmatmul.mubr.msk.bf16.vlgmr.msra.gmra.mrb[40].mxu0 %vm369_vm2, %v1349_v22 }
 0xc21   :  { %2742 = vmatpush3.bf16.msra.mxu0 %v1619_v23  ;;  %2743 = vmatprep.mubr.msk.bf16.mxu0 %vm2967_vm1, %v2966_v16 }
 0xc22   :  { %2753 = vmatprep.subr.bf16.mxu0 %v2966_v16 }
 0xc80   :  { %v1353_v24 = vpop.permute.xlu0 %1352 }
 0xc81   :  { %v1360_v26 = vpack.c.bf16 %v1353_v24, %v1353_v24 }
 0xc83   :  { %v1425_v27 = vsel %vm369_vm2, %v1360_v26, 0 }
 0xc84   :  { %2724 = vmatpush3.bf16.xpose.msra.mxu1 %v1425_v27  ;;  %v2834_v28 = vpop.permute.xlu1 %2833  ;;  %v1345_v36 = vpop.permute.xlu0 %1344 }
 0xc85   :  { %v2836_v29 = vunpack.i.h.bf16 %v2834_v28  ;;  %v2835_v30 = vunpack.i.l.bf16 %v2834_v28  ;;  %2735 = vmatprep.subr.bf16.mxu1 %v2966_v16  ;;  %v1350_v37 = vpack.c.bf16 %v1345_v36, %v1345_v36 }
 0xc87   :  { %v1362_v31 = vpack.c.bf16 %v2836_v29, %v2836_v29  ;;  %v1348_v32 = vpack.c.bf16 %v2835_v30, %v2835_v30 }
 0xc89   :  { %v1517_v61 = vsel %vm369_vm2, %v1362_v31, 0 }
 0xc8b   :  { %2726 = vmatmul.mubr.msk.bf16.vlgmr.msra.gmra.mrb[32].mxu1 %vm369_vm2, %v1348_v32 }
 0xc8c   :  { %2736 = vmatpush3.bf16.xpose.msra.mxu1 %v1517_v61  ;;  %2737 = vmatprep.mubr.msk.bf16.mxu1 %vm2967_vm1, %v2966_v16 }
 0xc8d   :  { %2747 = vmatprep.subr.bf16.mxu1 %v2966_v16 }
 0xc93   :  { %2738 = vmatmul.mubr.msk.bf16.vlgmr.msra.gmra.mrb[36].mxu1 %vm369_vm2, %v1350_v37  ;;  %v1373_v37 = vpack.c.bf16 %v3380_v3, %v3380_v3 }
 0xc94   :  { %2749 = vmatprep.mubr.msk.bf16.mxu1 %vm2967_vm1, %v2966_v16 }
 0xceb   :  { %v1415_v38 = vpop.f32.mrb[36].mxu0 }
 0xcec   :  { %v2721_v39 = vpop.f32.mrb[37].mxu0  ;;  %v1559_v49 = vmul.f32 0.25, %v1415_v38 }
 0xced   :  { %v1418_v41 = vpop.f32.mrb[38].mxu0 }
 0xcee   :  { %v2722_v42 = vpop.f32.mrb[39].mxu0  ;;  %v1563_v59 = vadd.f32 %v1559_v49, %v3222_v40 }
 0xcf0   :  { %v1567_v1 = vsel %vm562_vm4, %v1563_v59, -inf }
 0xcf3   :  { %v1507_v43 = vpop.f32.mrb[40].mxu0 }
 0xcf4   :  { %v2733_v44 = vpop.f32.mrb[41].mxu0  ;;  %v1561_v57 = vmul.f32 0.25, %v1507_v43 }
 0xcf5   :  { %v1510_v45 = vpop.f32.mrb[42].mxu0  ;;  %v1711_v44 = vsel %vm614_vm3, %v1373_v37, 0 }
 0xcf6   :  { %v2734_v47 = vpop.f32.mrb[43].mxu0  ;;  %v1565_v2 = vadd.f32 %v1561_v57, %v3230_v46 }
 0xcf8   :  { %v1573_v7 = vsel %vm562_vm4, %v1565_v2, -inf }
 0xd5e   :  { %v1461_v48 = vpop.f32.mrb[32].mxu1 }
 0xd5f   :  { %v1560_v50 = vmul.f32 0.25, %v1461_v48  ;;  %v2727_v51 = vpop.f32.mrb[33].mxu1 }
 0xd60   :  { %v1464_v52 = vpop.f32.mrb[34].mxu1  ;;  %v2862_v51 = vld [vmem:[%s3639_s1 + $0x10] sm:$0xff]  }
 0xd61   :  { %v2728_v55 = vpop.f32.mrb[35].mxu1  ;;  %v1564_v56 = vadd.f32 %v1560_v50, %v3210_v25  ;;  %v2863_v52 = vld [vmem:[%s3639_s1 + $0x18] sm:$0xff]  }
 0xd63   :  { %v1570_v58 = vsel %vm562_vm4, %v1564_v56, -inf }
 0xd64   :  { %1571 = vmax.xlane.f32.xlu0 %v1570_v58 }
 0xd66   :  { %v1553_v60 = vpop.f32.mrb[36].mxu1 }
 0xd67   :  { %v1562_v62 = vmul.f32 0.25, %v1553_v60  ;;  %v2739_v0 = vpop.f32.mrb[37].mxu1 }
 0xd68   :  { %v1556_v4 = vpop.f32.mrb[38].mxu1  ;;  %1568 = vmax.xlane.f32.xlu0 %v1567_v1 }
 0xd69   :  { %v2740_v5 = vpop.f32.mrb[39].mxu1  ;;  %v1566_v6 = vadd.f32 %v1562_v62, %v3217_v35 }
 0xd6b   :  { %v1576_v25 = vsel %vm562_vm4, %v1566_v6, -inf }
 0xd6c   :  { %1577 = vmax.xlane.f32.xlu1 %v1576_v25  ;;  %1574 = vmax.xlane.f32.xlu0 %v1573_v7 }
 0xd7d   :  { %1368 = vrot.lane.b32.xlu1 %v3380_v3, %s3640_s9 }
 0xdf1   :  { %v1572_v40 = vpop.xlane.xlu0 %1571 }
 0xdf2   :  { %v1580_v63 = vsub.f32 %v1564_v56, %v1572_v40 }
 0xdf4   :  { %v1585_v8 = vmul.f32 1.442695, %v1580_v63 }
 0xdf5   :  { %v1569_v9 = vpop.xlane.xlu0 %1568 }
 0xdf6   :  { %2908 = vpow2.f32 %v1585_v8  ;;  %v1579_v46 = vsub.f32 %v1563_v59, %v1569_v9 }
 0xdf8   :  { %v1583_v10 = vmul.f32 1.442695, %v1579_v46 }
 0xdf9   :  { %v1578_v11 = vpop.xlane.xlu1 %1577  ;;  %v1575_v33 = vpop.xlane.xlu0 %1574 }
 0xdfa   :  { %2910 = vpow2.f32 %v1583_v10  ;;  %v1582_v12 = vsub.f32 %v1566_v6, %v1578_v11  ;;  %v1581_v20 = vsub.f32 %v1565_v2, %v1575_v33 }
 0xdfc   :  { %v1589_v35 = vmul.f32 1.442695, %v1582_v12  ;;  %v1587_v21 = vmul.f32 1.442695, %v1581_v20 }
 0xdfd   :  { %v1369_v24 = vpop.permute.xlu1 %1368 }
 0xdfe   :  { %2912 = vpow2.f32 %v1589_v35  ;;  %v1374_v61 = vpack.c.bf16 %v1369_v24, %v1369_v24  ;;  %v2464_v35 = vld [vmem:[%s3590_s11 + $0x1] ss:$0 sm:$0xff] }
 0xdff   :  { %2914 = vpow2.f32 %v1587_v21 }
 0xe00   :  { %v2909_v13 = vpop.eup %2908  ;;  %v1757_v43 = vsel %vm614_vm3, %v1374_v61, 0 }
 0xe01   :  { %v1594_v14 = vsel %vm562_vm4, %v2909_v13, 0.0 }
 0xe02   :  { %1595 = vadd.xlane.f32.xlu0 %v1594_v14 }
 0xe04   :  { %v2911_v15 = vpop.eup %2910 }
 0xe05   :  { %v1591_v17 = vsel %vm562_vm4, %v2911_v15, 0.0 }
 0xe06   :  { %1592 = vadd.xlane.f32.xlu1 %v1591_v17 }
 0xe08   :  { %v2913_v18 = vpop.eup %2912 }
 0xe09   :  { %v1600_v19 = vsel %vm562_vm4, %v2913_v18, 0.0  ;;  %v2915_v22 = vpop.eup %2914 }
 0xe0a   :  { %1601 = vadd.xlane.f32.xlu0 %v1600_v19  ;;  %v1597_v23 = vsel %vm562_vm4, %v2915_v22, 0.0 }
 0xe20   :  { %1364 = vrot.lane.b32.xlu0 %v3393_v34, %s3640_s9 }
 0xe3f   :  { %1598 = vadd.xlane.f32.xlu0 %v1597_v23 }
 0xe8f   :  { %v1596_v26 = vpop.xlane.xlu0 %1595 }
 0xe90   :  { %2916 = vrcp.f32 %v1596_v26 }
 0xe93   :  { %v1593_v27 = vpop.xlane.xlu1 %1592 }
 0xe94   :  { %2918 = vrcp.f32 %v1593_v27 }
 0xe97   :  { %v1602_v28 = vpop.xlane.xlu0 %1601 }
 0xe98   :  { %2920 = vrcp.f32 %v1602_v28 }
 0xe9a   :  { %v2917_v29 = vpop.eup %2916 }
 0xe9b   :  { %v1365_v30 = vpop.permute.xlu0 %1364  ;;  %v1608_v31 = vmul.f32 %v2917_v29, %v2909_v13 }
 0xe9c   :  { %v1372_v32 = vpack.c.bf16 %v1365_v30, %v1365_v30 }
 0xe9d   :  { %v1612_v39 = vpack.c.bf16 %v1608_v31, %v1608_v31 }
 0xe9e   :  { %v2919_v34 = vpop.eup %2918  ;;  %v1665_v36 = vsel %vm614_vm3, %v1372_v32, 0 }
 0xe9f   :  { %v1607_v38 = vmul.f32 %v2919_v34, %v2911_v15  ;;  %2748 = vmatpush3.bf16.msra.mxu1 %v1665_v36  ;;  %v2865_v34 = vld [vmem:[%s3593_s14 + $0x18] sm:$0xff]  }
 0xea0   :  { %2759 = vmatprep.subr.bf16.mxu1 %v2966_v16 }
 0xea1   :  { %v1611_v41 = vpack.c.bf16 %v1607_v38, %v1607_v38 }
 0xea2   :  { %v2921_v42 = vpop.eup %2920  ;;  %2750 = vmatmul.mubr.msk.bf16.vlgmr.msra.gmra.mrb[40].mxu1 %vm562_vm4, %v1612_v39 }
 0xea3   :  { %2744 = vmatmul.mubr.msk.bf16.vlgmr.msra.gmra.mrb[44].mxu0 %vm562_vm4, %v1611_v41  ;;  %2760 = vmatpush3.bf16.msra.mxu1 %v1757_v43  ;;  %v1610_v45 = vmul.f32 %v2921_v42, %v2913_v18 }
 0xea4   :  { %2754 = vmatpush3.bf16.msra.mxu0 %v1711_v44  ;;  %2761 = vmatprep.mubr.msk.bf16.mxu1 %vm2967_vm1, %v2966_v16  ;;  %v2470_v44 = vld [vmem:[%s3591_s12 + $0x1] ss:$0 sm:$0xff] }
 0xea5   :  { %2755 = vmatprep.mubr.msk.bf16.mxu0 %vm2967_vm1, %v2966_v16  ;;  %2765 = vmatprep.subr.bf16.mxu0 %v2966_v16  ;;  %v1614_v3 = vpack.c.bf16 %v1610_v45, %v1610_v45 }
 0xea6   :  { %2773 = vmatprep.subr.bf16.mxu1 %v2966_v16 }
 0xeaa   :  { %2762 = vmatmul.mubr.msk.bf16.vlgmr.msra.gmra.mrb[44].mxu1 %vm562_vm4, %v1614_v3 }
 0xeab   :  { %2777 = vmatprep.mubr.msk.bf16.mxu1 %vm2967_vm1, %v2966_v16 }
 0xecc   :  { %v1599_v47 = vpop.xlane.xlu0 %1598 }
 0xecd   :  { %2922 = vrcp.f32 %v1599_v47 }
 0xed7   :  { %v2923_v48 = vpop.eup %2922 }
 0xed8   :  { %v1609_v49 = vmul.f32 %v2923_v48, %v2915_v22  ;;  %v2471_v48 = vld [vmem:[%s3592_s13 + $0x1] ss:$0 sm:$0xff] }
 0xeda   :  { %v1613_v50 = vpack.c.bf16 %v1609_v49, %v1609_v49 }
 0xedc   :  { %2756 = vmatmul.mubr.msk.bf16.vlgmr.msra.gmra.mrb[48].mxu0 %vm562_vm4, %v1613_v50 }
 0xedd   :  { %2769 = vmatprep.mubr.msk.bf16.mxu0 %vm2967_vm1, %v2966_v16  ;;  %2766 = vmatpush3.bf16.msra.mxu0 %v2862_v51 }
 0xede   :  { %2767 = vmatprep.subr.bf16.mxu0 %v2966_v16 }
 0xee1   :  { %2768 = vmatpush3.bf16.msra.mxu0 %v2863_v52 }
 0xee2   :  { %2781 = vmatprep.subr.bf16.mxu0 %v2966_v16 }
 0xf75   :  { %v1701_v55 = vpop.f32.mrb[40].mxu1 }
 0xf76   :  { %v1655_v56 = vpop.f32.mrb[44].mxu0  ;;  %v2751_v57 = vpop.f32.mrb[41].mxu1 }
 0xf77   :  { %v2745_v58 = vpop.f32.mrb[45].mxu0  ;;  %v1704_v59 = vpop.f32.mrb[42].mxu1  ;;  %v2868_v57 = vld [vmem:[%s3595_s16 + $0x30] sm:$0xff]  }
 0xf78   :  { %v1658_v60 = vpop.f32.mrb[46].mxu0  ;;  %v2752_v62 = vpop.f32.mrb[43].mxu1  ;;  %v2869_v58 = vld [vmem:[%s3595_s16 + $0x38] sm:$0xff]   ;;  %v2477_v59 = vld [vmem:[%s3594_s15 + $0x1] ss:$0 sm:$0xff] }
 0xf79   :  { %v2746_v0 = vpop.f32.mrb[47].mxu0 }
 0xf7d   :  { %v1793_v1 = vpop.f32.mrb[44].mxu1 }
 0xf7e   :  { %v2837_v2 = vpack.i.bf16 %v1793_v1, %v1701_v55  ;;  %v2763_v4 = vpop.f32.mrb[45].mxu1  ;;  %v2866_v55 = vld [vmem:[%s3595_s16 + $0x20] sm:$0xff]  }
 0xf7f   :  { %v1796_v5 = vpop.f32.mrb[46].mxu1 }
 0xf80   :  { %2838 = vrot.lane.b32.xlu0 %v2837_v2, %s3641_s6  ;;  %v2764_v6 = vpop.f32.mrb[47].mxu1 }
 0xfaf   :  { %v1747_v25 = vpop.f32.mrb[48].mxu0 }
 0xfb0   :  { %v2757_v7 = vpop.f32.mrb[49].mxu0 }
 0xfb1   :  { %v1750_v40 = vpop.f32.mrb[50].mxu0 }
 0xfb2   :  { %v2758_v63 = vpop.f32.mrb[51].mxu0 }
 0xff2   :  { %v2839_v8 = vpop.permute.xlu0 %2838 }
 0xff3   :  { %v2841_v9 = vunpack.i.h.bf16 %v2839_v8  ;;  %v2840_v46 = vunpack.i.l.bf16 %v2839_v8 }
 0xff5   :  { %v1803_v10 = vsel %vm369_vm2, %v1655_v56, %v2840_v46  ;;  %v1808_v11 = vsel %vm369_vm2, %v1747_v25, %v2841_v9  ;;  %v2867_v56 = vld [vmem:[%s3595_s16 + $0x28] sm:$0xff]  }
 0xff6   :  { %v1809_v12 = vpack.c.bf16 %v1808_v11, %v1803_v10 }
 0xff8   :  { %2770 = vmatmul.mubr.msk.bf16.vlgmr.msra.gmra.mrb[52].mxu0 %vm89_vm0, %v1809_v12 }
 0xff9   :  { %2789 = vmatprep.mubr.msk.bf16.mxu0 %vm2967_vm1, %v2966_v16  ;;  %2782 = vmatpush3.bf16.msra.mxu0 %v2866_v55 }
 0xffa   :  { %2783 = vmatprep.subr.bf16.mxu0 %v2966_v16 }
 0xffd   :  { %2784 = vmatpush3.bf16.msra.mxu0 %v2867_v56 }
 0xffe   :  { %2785 = vmatprep.subr.bf16.mxu0 %v2966_v16 }
0x1001   :  { %2786 = vmatpush3.bf16.msra.mxu0 %v2868_v57 }
0x1002   :  { %2787 = vmatprep.subr.bf16.mxu0 %v2966_v16 }
0x1005   :  { %2788 = vmatpush3.bf16.msra.mxu0 %v2869_v58 }
0x1006   :  { %2809 = vmatprep.subr.bf16.mxu0 %v2966_v16 }
0x10cb   :  { %v1872_v13 = vpop.f32.mrb[52].mxu0 }
0x10cc   :  { %v1873_v14 = vadd.f32 %v2464_v35, %v1872_v13  ;;  %v2771_v15 = vpop.f32.mrb[53].mxu0 }
0x10cd   :  { %v1875_v17 = vpop.f32.mrb[54].mxu0 }
0x10ce   :  { %v1876_v18 = vadd.f32 %v2464_v35, %v1875_v17  ;;  %v2772_v19 = vpop.f32.mrb[55].mxu0  ;;  %v1879_v33 = vadd.f32 %v1873_v14, %v3354_v53 }
0x10d0   :  { %v1885_v20 = vsel %vm89_vm0, %v1879_v33, 0.0  ;;  %v1880_v21 = vadd.f32 %v1876_v18, %v3356_v54  ;;  %v2864_v54 = vld [vmem:[%s3593_s14 + $0x10] sm:$0xff]  }
0x10d1   :  { %1886 = vadd.xlane.f32.xlu1 %v1885_v20  ;;  %2774 = vmatpush3.bf16.msra.mxu1 %v2864_v54 }
0x10d2   :  { %v1888_v22 = vsel %vm89_vm0, %v1880_v21, 0.0  ;;  %2775 = vmatprep.subr.bf16.mxu1 %v2966_v16 }
0x10d5   :  { %1889 = vadd.xlane.f32.xlu1 %v1888_v22  ;;  %2776 = vmatpush3.bf16.msra.mxu1 %v2865_v34 }
0x10d6   :  { %2793 = vmatprep.subr.bf16.mxu1 %v2966_v16 }
0x115e   :  { %v1887_v23 = vpop.xlane.xlu1 %1886 }
0x115f   :  { %v1891_v24 = vmul.f32 0.03125, %v1887_v23 }
0x1161   :  { %v1893_v26 = vsub.f32 %v1879_v33, %v1891_v24  ;;  %v2490_v33 = vld [vmem:[%s3596_s17 + $0x1] ss:$0 sm:$0xff] }
0x1162   :  { %v1890_v27 = vpop.xlane.xlu1 %1889 }
0x1163   :  { %v1892_v28 = vmul.f32 0.03125, %v1890_v27  ;;  %v1895_v29 = vmul.f32 %v1893_v26, %v1893_v26 }
0x1165   :  { %v1894_v30 = vsub.f32 %v1880_v21, %v1892_v28  ;;  %v1897_v31 = vsel %vm89_vm0, %v1895_v29, 0.0 }
0x1166   :  { %1898 = vadd.xlane.f32.xlu1 %v1897_v31 }
0x1167   :  { %v1896_v32 = vmul.f32 %v1894_v30, %v1894_v30 }
0x1169   :  { %v1900_v53 = vsel %vm89_vm0, %v1896_v32, 0.0 }
0x116a   :  { %1901 = vadd.xlane.f32.xlu1 %v1900_v53 }
0x11f3   :  { %v1899_v61 = vpop.xlane.xlu1 %1898 }
0x11f4   :  { %v1903_v36 = vmul.f32 0.03125, %v1899_v61 }
0x11f6   :  { %v1905_v37 = vadd.f32 1e-12, %v1903_v36 }
0x11f7   :  { %v1902_v38 = vpop.xlane.xlu1 %1901 }
0x11f8   :  { %2924 = vrsqrt.f32 %v1905_v37  ;;  %v1904_v39 = vmul.f32 0.03125, %v1902_v38 }
0x11fa   :  { %v1906_v41 = vadd.f32 1e-12, %v1904_v39 }
0x11fc   :  { %2926 = vrsqrt.f32 %v1906_v41  ;;  %v2870_v41 = vld [vmem:[%s3599_s20] sm:$0xff]  }
0x1202   :  { %v2925_v42 = vpop.eup %2924 }
0x1203   :  { %v1909_v43 = vmul.f32 %v2925_v42, %v1893_v26  ;;  %v2871_v42 = vld [vmem:[%s3599_s20 + $0x8] sm:$0xff]  }
0x1205   :  { %v1917_v3 = vmul.f32 %v2470_v44, %v1909_v43 }
0x1206   :  { %v2927_v45 = vpop.eup %2926 }
0x1207   :  { %v1910_v47 = vmul.f32 %v2927_v45, %v1894_v30  ;;  %v1925_v50 = vadd.f32 %v2471_v48, %v1917_v3 }
0x1209   :  { %v1918_v49 = vmul.f32 %v2470_v44, %v1910_v47 }
0x120b   :  { %v1926_v51 = vadd.f32 %v2471_v48, %v1918_v49 }
0x120d   :  { %v1927_v52 = vpack.c.bf16 %v1926_v51, %v1925_v50 }
0x120f   :  { %2778 = vmatmul.mubr.msk.bf16.vlgmr.msra.gmra.mrb[48].mxu1 %vm89_vm0, %v1927_v52  ;;  %v2499_v52 = vld [vmem:[%s3598_s19 + $0x1] ss:$0 sm:$0xff] }
0x1210   :  { %2797 = vmatprep.mubr.msk.bf16.mxu1 %vm2967_vm1, %v2966_v16  ;;  %2794 = vmatpush3.bf16.msra.mxu1 %v2870_v41 }
0x1211   :  { %2795 = vmatprep.subr.bf16.mxu1 %v2966_v16 }
0x1214   :  { %2796 = vmatpush3.bf16.msra.mxu1 %v2871_v42 }
0x1215   :  { %2801 = vmatprep.subr.bf16.mxu1 %v2966_v16 }
0x12e2   :  { %v1990_v60 = vpop.f32.mrb[48].mxu1 }
0x12e3   :  { %v1991_v62 = vadd.f32 %v2477_v59, %v1990_v60  ;;  %v2779_v0 = vpop.f32.mrb[49].mxu1 }
0x12e4   :  { %v1993_v1 = vpop.f32.mrb[50].mxu1 }
0x12e5   :  { %v1999_v2 = vmul.f32 0.044715, %v1991_v62  ;;  %v1994_v4 = vadd.f32 %v2477_v59, %v1993_v1  ;;  %v2780_v5 = vpop.f32.mrb[51].mxu1  ;;  %v1997_v13 = vmul.f32 0.5, %v1991_v62 }
0x12e6   :  { %v2500_v5 = vld [vmem:[%s3600_s21] ss:$0 sm:$0xff] }
0x12e7   :  { %v2001_v6 = vmul.f32 %v1999_v2, %v1991_v62  ;;  %v2000_v25 = vmul.f32 0.044715, %v1994_v4  ;;  %v1998_v14 = vmul.f32 0.5, %v1994_v4  ;;  %v2872_v2 = vld [vmem:[%s3601_s22] sm:$0xff]  }
0x12e9   :  { %v2003_v7 = vmul.f32 %v2001_v6, %v1991_v62  ;;  %v2002_v40 = vmul.f32 %v2000_v25, %v1994_v4 }
0x12eb   :  { %v2005_v63 = vadd.f32 %v2003_v7, %v1991_v62  ;;  %v2004_v8 = vmul.f32 %v2002_v40, %v1994_v4 }
0x12ed   :  { %v2007_v9 = vmul.f32 0.7978846, %v2005_v63  ;;  %v2006_v46 = vadd.f32 %v2004_v8, %v1994_v4  ;;  %v2873_v4 = vld [vmem:[%s3601_s22 + $0x8] sm:$0xff]  }
0x12ef   :  { %2928 = vtanh.f32 %v2007_v9  ;;  %v2008_v10 = vmul.f32 0.7978846, %v2006_v46  ;;  %v2874_v46 = vld [vmem:[%s3603_s24] sm:$0xff]  }
0x12f1   :  { %2930 = vtanh.f32 %v2008_v10  ;;  %v2875_v10 = vld [vmem:[%s3603_s24 + $0x8] sm:$0xff]  }
0x12f9   :  { %v2929_v11 = vpop.eup %2928 }
0x12fa   :  { %v2011_v12 = vadd.f32 1.0, %v2929_v11  ;;  %v2504_v11 = vld [vmem:[%s3602_s23] ss:$0 sm:$0xff]  ;;  %s2970_s23 = smov [#allocation2]  }
0x12fb   :  { %v2931_v35 = vpop.eup %2930  ;;  %s2376_s24 = sshll.u32 %s2970_s23, 4  ;;  %s2377_s24 = int_to_ptr.vmem [resolvable:$true] %s2376_s24 }
0x12fc   :  { %v2012_v15 = vadd.f32 1.0, %v2931_v35  ;;  %v2013_v17 = vmul.f32 %v2011_v12, %v1997_v13  ;;  %p2947_p1 = scmp.lt.s32.totalorder %s2377_s24, %s2377_s24 }
0x12fe   :  { %v2014_v18 = vmul.f32 %v2012_v15, %v1998_v14 }
0x1300   :  { %v2015_v19 = vpack.c.bf16 %v2014_v18, %v2013_v17 }
0x1302   :  { %2790 = vmatmul.mubr.msk.bf16.vlgmr.msra.gmra.mrb[56].mxu0 %vm1046_vm5, %v2015_v19 }
0x1303   :  { %2813 = vmatprep.mubr.msk.bf16.mxu0 %vm2967_vm1, %v2966_v16  ;;  %2810 = vmatpush3.bf16.msra.mxu0 %v2874_v46 }
0x1304   :  { %2811 = vmatprep.subr.bf16.mxu0 %v2966_v16 }
0x1307   :  { %2812 = vmatpush3.bf16.msra.mxu0 %v2875_v10 }
0x13d5   :  { %v2094_v20 = vpop.f32.mrb[56].mxu0 }
0x13d6   :  { %v2791_v21 = vpop.f32.mrb[57].mxu0  ;;  %v2095_v23 = vadd.f32 %v2490_v33, %v2094_v20 }
0x13d7   :  { %v2097_v22 = vpop.f32.mrb[58].mxu0 }
0x13d8   :  { %v2098_v24 = vadd.f32 %v2490_v33, %v2097_v22  ;;  %v2792_v26 = vpop.f32.mrb[59].mxu0  ;;  %v2101_v29 = vadd.f32 %v2095_v23, %v1925_v50  ;;  %v2498_v50 = vld [vmem:[%s3597_s18 + $0x1] ss:$0 sm:$0xff] }
0x13da   :  { %v2102_v27 = vadd.f32 %v2098_v24, %v1926_v51  ;;  %v2107_v30 = vsel %vm89_vm0, %v2101_v29, 0.0 }
0x13dc   :  { %v2110_v28 = vsel %vm89_vm0, %v2102_v27, 0.0 }
0x13dd   :  { %2111 = vadd.xlane.f32.xlu1 %v2110_v28 }
0x13e1   :  { %2108 = vadd.xlane.f32.xlu1 %v2107_v30 }
0x146a   :  { %v2112_v31 = vpop.xlane.xlu1 %2111 }
0x146b   :  { %v2114_v32 = vmul.f32 0.03125, %v2112_v31 }
0x146d   :  { %v2116_v53 = vsub.f32 %v2102_v27, %v2114_v32 }
0x146e   :  { %v2109_v54 = vpop.xlane.xlu1 %2108 }
0x146f   :  { %v2113_v34 = vmul.f32 0.03125, %v2109_v54  ;;  %v2118_v61 = vmul.f32 %v2116_v53, %v2116_v53 }
0x1471   :  { %v2115_v36 = vsub.f32 %v2101_v29, %v2113_v34  ;;  %v2122_v37 = vsel %vm89_vm0, %v2118_v61, 0.0 }
0x1472   :  { %2123 = vadd.xlane.f32.xlu0 %v2122_v37 }
0x1473   :  { %v2117_v38 = vmul.f32 %v2115_v36, %v2115_v36 }
0x1475   :  { %v2119_v39 = vsel %vm89_vm0, %v2117_v38, 0.0 }
0x1476   :  { %2120 = vadd.xlane.f32.xlu1 %v2119_v39 }
0x14ff   :  { %v2124_v43 = vpop.xlane.xlu0 %2123 }
0x1500   :  { %v2126_v44 = vmul.f32 0.03125, %v2124_v43 }
0x1502   :  { %v2128_v45 = vadd.f32 1e-12, %v2126_v44 }
0x1503   :  { %v2121_v3 = vpop.xlane.xlu1 %2120 }
0x1504   :  { %2932 = vrsqrt.f32 %v2128_v45  ;;  %v2125_v47 = vmul.f32 0.03125, %v2121_v3 }
0x1506   :  { %v2127_v48 = vadd.f32 1e-12, %v2125_v47 }
0x1508   :  { %2934 = vrsqrt.f32 %v2127_v48 }
0x150e   :  { %v2933_v49 = vpop.eup %2932 }
0x150f   :  { %v2132_v51 = vmul.f32 %v2933_v49, %v2116_v53 }
0x1511   :  { %v2140_v55 = vmul.f32 %v2498_v50, %v2132_v51 }
0x1512   :  { %v2935_v56 = vpop.eup %2934 }
0x1513   :  { %v2148_v57 = vadd.f32 %v2499_v52, %v2140_v55  ;;  %v2131_v58 = vmul.f32 %v2935_v56, %v2115_v36 }
0x1515   :  { %v2139_v59 = vmul.f32 %v2498_v50, %v2131_v58  ;;  %v2150_v60 = vrot.slane %v2148_v57, 7 }
0x1517   :  { %v2147_v62 = vadd.f32 %v2499_v52, %v2139_v59 }
0x1519   :  { %v2153_v0 = vsel %vm2152_vm6, %v2147_v62, %v2150_v60 }
0x151a   :  { %v2154_v1 = vpack.c.bf16 %v2153_v0, %v2153_v0 }
0x151c   :  { %2798 = vmatmul.mubr.msk.bf16.vlgmr.msra.gmra.mrb[52].mxu1 %vm89_vm0, %v2154_v1 }
0x151d   :  { %2805 = vmatprep.mubr.msk.bf16.mxu1 %vm2967_vm1, %v2966_v16  ;;  %2802 = vmatpush3.bf16.msra.mxu1 %v2872_v2 }
0x151e   :  { %2803 = vmatprep.subr.bf16.mxu1 %v2966_v16  ;;  %v2508_v16 = vld [vmem:[%s3604_s25] ss:$0 sm:$0xff]  ;;  %s2942_s25 = scalar_lea.vmem %s2377_s24, 32 }
0x151f   :  { %p2943_p0 = scmp.ne.s32.totalorder %s2377_s24, %s2942_s25  ;;  %p2948_p2 = scmp.lt.s32.totalorder %s2942_s25, %s2942_s25 }
0x1521   :  { %2804 = vmatpush3.bf16.msra.mxu1 %v2873_v4  ;;  %p2949_p3 = por %p2948_p2, %p2947_p1 }
0x1523   :  { %p2950_p4 = pnand %p2949_p3, %p2943_p0 }
0x15ef   :  { %v2215_v6 = vpop.f32.mrb[52].mxu1 }
0x15f0   :  { %v2216_v25 = vadd.f32 %v2500_v5, %v2215_v6  ;;  %v2799_v7 = vpop.f32.mrb[53].mxu1 }
0x15f1   :  { %v2218_v40 = vpop.f32.mrb[54].mxu1 }
0x15f2   :  { %2936 = vtanh.f32 %v2216_v25  ;;  %v2800_v63 = vpop.f32.mrb[55].mxu1 }
0x15fc   :  { %v2937_v8 = vpop.eup %2936 }
0x15fd   :  { %v2222_v9 = vpack.c.bf16 %v2937_v8, %v2937_v8 }
0x15ff   :  { %2806 = vmatmul.mubr.msk.bf16.vlgmr.msra.gmra.mrb[56].mxu1 %vm89_vm0, %v2222_v9 }
0x16d2   :  { %v2283_v12 = vpop.f32.mrb[56].mxu1 }
0x16d3   :  { %v2284_v35 = vadd.f32 %v2504_v11, %v2283_v12  ;;  %v2807_v13 = vpop.f32.mrb[57].mxu1 }
0x16d4   :  { %v2286_v14 = vpop.f32.mrb[58].mxu1 }
0x16d5   :  { %v2289_v15 = vmax.f32 %v2284_v35, 0.0  ;;  %v2808_v17 = vpop.f32.mrb[59].mxu1 }
0x16d7   :  { %v2290_v18 = vpack.c.bf16 %v2289_v15, %v2289_v15 }
0x16d9   :  { %2814 = vmatmul.mubr.msk.bf16.vlgmr.msra.gmra.mrb[60].mxu0 %vm89_vm0, %v2290_v18 }
0x17ac   :  { %v2351_v19 = vpop.f32.mrb[60].mxu0 }
0x17ad   :  { %v2352_v33 = vadd.f32 %v2508_v16, %v2351_v19  ;;  %v2815_v20 = vpop.f32.mrb[61].mxu0 }
0x17ae   :  { %v2354_v21 = vpop.f32.mrb[62].mxu0 }
0x17af   :  { %v2816_v22 = vpop.f32.mrb[63].mxu0  ;;  %v2358_v23 = vsel %vm2357_vm7, %v2352_v33, -inf }
0x17b0   :  { %2359 = vmax.xlane.f32.xlu1 %v2358_v23 }
0x183d   :  { %v2360_v24 = vpop.xlane.xlu1 %2359 }
0x183e   :  { %v2361_v26 = vsub.f32 %v2352_v33, %v2360_v24 }
0x1840   :  { %v2362_v27 = vmul.f32 1.442695, %v2361_v26 }
0x1842   :  { %2938 = vpow2.f32 %v2362_v27 }
0x184c   :  { %v2939_v28 = vpop.eup %2938 }
0x184d   :  { %v2364_v29 = vsel %vm2357_vm7, %v2939_v28, 0.0 }
0x184e   :  { %2365 = vadd.xlane.f32.xlu1 %v2364_v29 }
0x18db   :  { %v2366_v30 = vpop.xlane.xlu1 %2365 }
0x18dc   :  { %2940 = vrcp.f32 %v2366_v30 }
0x18e6   :  { %v2941_v31 = vpop.eup %2940 }
0x18e7   :  { %v2368_v32 = vmul.f32 %v2941_v31, %v2939_v28 }
0x18e9   :  { %2369 = vst.msk [vmem:[#allocation2] sm:$0x3] %vm2357_vm7, %v2368_v32 }
0x18ea   :  { %2953 = shalt.err (!%p2950_p4)
}
0x18eb   :  { %s2954_s1 = scalar_lea.hbm %s3605_s26, 32 }
0x18ec   :  { %p2955_p5 = scmp.ne.s32.totalorder %s3605_s26, %s2954_s1  ;;  %p2958_p6 = scmp.lt.u32.totalorder %s2954_s1, %s3605_s26 }
0x18ee   :  { %p2960_p7 = pnand %p2958_p6, %p2955_p5 }
0x18f0   :  { %2963 = shalt.err (!%p2960_p7)
}
0x18f1   :  { %2379 = dma.vmem_to_hbm [thread:$0]  %s2377_s24, 32, %s3605_s26, [#allocation3]  }
0x18f2   :  { %2964 = dma.done.wait [#allocation3], 32  }
0x18f3   :  { %2965 = vsyncadd [#allocation3], 4294967264 }
0x18f4   :  { %2383 = vsyncpa [#allocation3], 1 }

</bundles_post_ra>
